<compile_context>
chip_gen: v7x
topology: tpu7x:2x2x1
jax: 0.10.0
libtpu: 0.0.40
codegen_flags: <defaults>
</compile_context>

<pallas_src>
import math

import jax
import jax.numpy as jnp
from jax.experimental import pallas as pl
from jax.experimental.pallas import tpu as pltpu


# ----------------------------------------------------------------------------- kernels
def conv1_fused_kernel(a_ref, z0_ref, d_ref, b1_ref, w2_ref, h1_ref, z1_ref, acc_ref):
    """GraphConv #1 (K-tiled A @ Z0 into f32 scratch) fused with the layer-2
    per-node transform:
        h1 = relu(d * sum_k(A_ik @ Z0_k) + b1)        (stored bf16)
        Z1 = bf16(d * (h1 @ W2))                      (stored bf16)
    """
    k = pl.program_id(1)

    @pl.when(k == 0)
    def _():
        acc_ref[...] = jnp.zeros_like(acc_ref)

    acc_ref[...] += jnp.dot(a_ref[...], z0_ref[...], preferred_element_type=jnp.float32)

    @pl.when(k == pl.num_programs(1) - 1)
    def _():
        h1 = jnp.maximum(acc_ref[...] * d_ref[...] + b1_ref[...], 0.0)
        h1_ref[...] = h1.astype(h1_ref.dtype)
        z1 = d_ref[...] * jnp.dot(h1, w2_ref[...], preferred_element_type=jnp.float32)
        z1_ref[...] = z1.astype(z1_ref.dtype)


def conv2_jk_kernel(a_ref, z1_ref, d_ref, b2_ref, h1_ref, wt_ref, wb_ref, y_ref, acc_ref):
    """GraphConv #2 (K-tiled) + JK('cat') projection without materializing the concat:
        h2 = relu(d * sum_k(A_ik @ Z1_k) + b2)
        Y  = bf16(h1 @ Wt + h2 @ Wb)      where Wout = [Wt; Wb]
    """
    k = pl.program_id(1)

    @pl.when(k == 0)
    def _():
        acc_ref[...] = jnp.zeros_like(acc_ref)

    acc_ref[...] += jnp.dot(a_ref[...], z1_ref[...], preferred_element_type=jnp.float32)

    @pl.when(k == pl.num_programs(1) - 1)
    def _():
        h2 = jnp.maximum(acc_ref[...] * d_ref[...] + b2_ref[...], 0.0)
        y = (jnp.dot(h1_ref[...].astype(jnp.float32), wt_ref[...],
                     preferred_element_type=jnp.float32)
             + jnp.dot(h2, wb_ref[...], preferred_element_type=jnp.float32))
        y_ref[...] = y.astype(y_ref.dtype)


def out_agg_kernel(a_ref, y_ref, bo_ref, o_ref, acc_ref):
    """Final unnormalized neighbor sum (g.update_all copy_u/sum) fused with the
    output bias:  out = sum_k(A_ik @ Y_k) + bout   (f32)."""
    k = pl.program_id(1)

    @pl.when(k == 0)
    def _():
        acc_ref[...] = jnp.zeros_like(acc_ref)

    acc_ref[...] += jnp.dot(a_ref[...], y_ref[...], preferred_element_type=jnp.float32)

    @pl.when(k == pl.num_programs(1) - 1)
    def _():
        o_ref[...] = acc_ref[...] + bo_ref[...]


# ----------------------------------------------------------------------------- helpers
def _round_up(x, m):
    return (x + m - 1) // m * m


def _nbytes(shape, dtype):
    return math.prod(shape) * jnp.dtype(dtype).itemsize


def _vmem_limit(blocks):
    """Explicit per-call VMEM budget: sum of (block, dtype, num_buffers) plus
    headroom for Mosaic-internal scratch; kept safely under v7x's 64 MiB."""
    footprint = sum(_nbytes(s, d) * b for s, d, b in blocks)
    return int(min(max(footprint + (16 << 20), 32 << 20), 56 << 20))


def _cparams(vmem_bytes):
    return pltpu.CompilerParams(
        dimension_semantics=("parallel", "arbitrary"),
        vmem_limit_bytes=vmem_bytes,
    )


# ----------------------------------------------------------------------------- wrapper
def jknet_forward(adj, feats, params, *, tm=256, tk=256):
    """adj: (N, N) float32 dense adjacency; feats: (N, in_dim) float32."""
    n = adj.shape[0]
    in_dim = feats.shape[1]
    hid = params["w1"].shape[1]
    out_dim = params["wout"].shape[1]

    n_pad = _round_up(n, math.lcm(tm, tk))
    hid_p = _round_up(hid, 128)
    out_p = _round_up(out_dim, 128)

    # Symmetric 'both' normalization (degrees clamped >= 1, as DGL does) -- fp32.
    deg = jnp.clip(adj.sum(axis=1), 1.0, None)
    d_inv_sqrt = (1.0 / jnp.sqrt(deg)).astype(jnp.float32)

    # Zero-pad to lane/sublane-friendly shapes ({0,1} adjacency is exact in bf16).
    # Pad columns of A are zero, so pad-row garbage never mixes into real rows.
    a_bf = jnp.zeros((n_pad, n_pad), jnp.bfloat16).at[:n, :n].set(adj.astype(jnp.bfloat16))
    d_p = jnp.ones((n_pad, 1), jnp.float32).at[:n, 0].set(d_inv_sqrt)
    x_p = jnp.zeros((n_pad, in_dim), jnp.float32).at[:n].set(feats)
    w1 = jnp.zeros((in_dim, hid_p), jnp.float32).at[:, :hid].set(params["w1"])
    b1 = jnp.zeros((1, hid_p), jnp.float32).at[:, :hid].set(params["b1"])
    w2 = jnp.zeros((hid_p, hid_p), jnp.float32).at[:hid, :hid].set(params["w2"])
    b2 = jnp.zeros((1, hid_p), jnp.float32).at[:, :hid].set(params["b2"])
    wt = jnp.zeros((hid_p, out_p), jnp.float32).at[:hid, :out_dim].set(params["wout"][:hid])
    wb = jnp.zeros((hid_p, out_p), jnp.float32).at[:hid, :out_dim].set(params["wout"][hid:])
    bo = jnp.zeros((1, out_p), jnp.float32).at[:, :out_dim].set(params["bout"])

    # Layer-0 per-node transform: tiny (N,8)@(8,128) matmul -> plain jnp.
    z0 = (d_p * (x_p @ w1)).astype(jnp.bfloat16)          # (n_pad, hid_p) bf16

    grid = (n_pad // tm, n_pad // tk)

    # BlockSpecs (row axis i is parallel, reduction axis k is last / arbitrary).
    a_spec = pl.BlockSpec((tm, tk), lambda i, k: (i, k))
    d_spec = pl.BlockSpec((tm, 1), lambda i, k: (i, 0))
    row_hid = pl.BlockSpec((tm, hid_p), lambda i, k: (i, 0))
    row_out = pl.BlockSpec((tm, out_p), lambda i, k: (i, 0))
    kblk_hid = pl.BlockSpec((tk, hid_p), lambda i, k: (k, 0))
    kblk_out = pl.BlockSpec((tk, out_p), lambda i, k: (k, 0))
    bias_hid = pl.BlockSpec((1, hid_p), lambda i, k: (0, 0))
    bias_out = pl.BlockSpec((1, out_p), lambda i, k: (0, 0))
    w_hh = pl.BlockSpec((hid_p, hid_p), lambda i, k: (0, 0))
    w_ho = pl.BlockSpec((hid_p, out_p), lambda i, k: (0, 0))

    # --- stage 1: h1 = relu(d*(A@Z0)+b1);  Z1 = bf16(d*(h1@W2))   (fused, K-tiled)
    vmem1 = _vmem_limit([
        ((tm, tk), jnp.bfloat16, 2), ((tk, hid_p), jnp.bfloat16, 2),
        ((tm, 1), jnp.float32, 2), ((1, hid_p), jnp.float32, 2),
        ((hid_p, hid_p), jnp.float32, 2),
        ((tm, hid_p), jnp.bfloat16, 2), ((tm, hid_p), jnp.bfloat16, 2),
        ((tm, hid_p), jnp.float32, 1),
    ])
    h1, z1 = pl.pallas_call(
        conv1_fused_kernel,
        grid=grid,
        in_specs=[a_spec, kblk_hid, d_spec, bias_hid, w_hh],
        out_specs=(row_hid, row_hid),
        out_shape=(jax.ShapeDtypeStruct((n_pad, hid_p), jnp.bfloat16),
                   jax.ShapeDtypeStruct((n_pad, hid_p), jnp.bfloat16)),
        scratch_shapes=[pltpu.VMEM((tm, hid_p), jnp.float32)],
        compiler_params=_cparams(vmem1),
    )(a_bf, z0, d_p, b1, w2)

    # --- stage 2: h2 = relu(d*(A@Z1)+b2);  Y = bf16(h1@Wt + h2@Wb)  (K-tiled)
    vmem2 = _vmem_limit([
        ((tm, tk), jnp.bfloat16, 2), ((tk, hid_p), jnp.bfloat16, 2),
        ((tm, 1), jnp.float32, 2), ((1, hid_p), jnp.float32, 2),
        ((tm, hid_p), jnp.bfloat16, 2),
        ((hid_p, out_p), jnp.float32, 2), ((hid_p, out_p), jnp.float32, 2),
        ((tm, out_p), jnp.bfloat16, 2),
        ((tm, hid_p), jnp.float32, 1),
    ])
    y = pl.pallas_call(
        conv2_jk_kernel,
        grid=grid,
        in_specs=[a_spec, kblk_hid, d_spec, bias_hid, row_hid, w_ho, w_ho],
        out_specs=row_out,
        out_shape=jax.ShapeDtypeStruct((n_pad, out_p), jnp.bfloat16),
        scratch_shapes=[pltpu.VMEM((tm, hid_p), jnp.float32)],
        compiler_params=_cparams(vmem2),
    )(a_bf, z1, d_p, b2, h1, wt, wb)

    # --- stage 3: out = A @ Y + bout   (unnormalized copy_u/sum + output bias, K-tiled)
    vmem3 = _vmem_limit([
        ((tm, tk), jnp.bfloat16, 2), ((tk, out_p), jnp.bfloat16, 2),
        ((1, out_p), jnp.float32, 2),
        ((tm, out_p), jnp.float32, 2),
        ((tm, out_p), jnp.float32, 1),
    ])
    out_padded = pl.pallas_call(
        out_agg_kernel,
        grid=grid,
        in_specs=[a_spec, kblk_out, bias_out],
        out_specs=row_out,
        out_shape=jax.ShapeDtypeStruct((n_pad, out_p), jnp.float32),
        scratch_shapes=[pltpu.VMEM((tm, out_p), jnp.float32)],
        compiler_params=_cparams(vmem3),
    )(a_bf, y, bo)

    return out_padded[:n, :out_dim]


def init_params(key, in_dim, hid_dim, out_dim):
    """Deterministic init matching the module's shapes (xavier-uniform-ish)."""
    k1, k2, k3, k4 = jax.random.split(key, 4)

    def xavier(k, fan_in, fan_out):
        bound = jnp.sqrt(6.0 / (fan_in + fan_out))
        return jax.random.uniform(k, (fan_in, fan_out), jnp.float32, -bound, bound)

    cat_dim = 2 * hid_dim  # mode='cat', num_layers=1 -> hid * (num_layers + 1)
    lin_bound = 1.0 / jnp.sqrt(float(cat_dim))
    return {
        "w1": xavier(k1, in_dim, hid_dim),
        "b1": jnp.zeros((1, hid_dim), jnp.float32),   # DGL GraphConv bias init = zeros
        "w2": xavier(k2, hid_dim, hid_dim),
        "b2": jnp.zeros((1, hid_dim), jnp.float32),
        "wout": xavier(k3, cat_dim, out_dim),
        "bout": jax.random.uniform(k4, (1, out_dim), jnp.float32, -lin_bound, lin_bound),
    }


if __name__ == "__main__":
    N, IN_DIM, HID_DIM, OUT_DIM = 200, 8, 32, 4   # N not a multiple of the tile -> exercises padding

    key = jax.random.PRNGKey(0)
    k_adj, k_feat, k_par = jax.random.split(key, 3)

    # Random symmetric graph with self-loops (guarantees nonzero degree).
    rand = jax.random.uniform(k_adj, (N, N))
    adj = (rand + rand.T > 1.2).astype(jnp.float32)
    adj = jnp.maximum(adj, jnp.eye(N, dtype=jnp.float32))

    feats = jax.random.normal(k_feat, (N, IN_DIM), jnp.float32)
    params = init_params(k_par, IN_DIM, HID_DIM, OUT_DIM)

    fwd = jax.jit(jknet_forward, static_argnames=("tm", "tk"))
    out = fwd(adj, feats, params)
    out = jax.block_until_ready(out)

    # Pure-JAX fp32 reference of the same math (kernel uses bf16 MXU inputs with
    # f32 accumulation, so compare with a bf16-appropriate tolerance).
    deg = jnp.clip(adj.sum(axis=1), 1.0, None)
    dis = 1.0 / jnp.sqrt(deg)
    a_norm = dis[:, None] * adj * dis[None, :]
    h1 = jnp.maximum(a_norm @ feats @ params["w1"] + params["b1"], 0.0)
    h2 = jnp.maximum(a_norm @ h1 @ params["w2"] + params["b2"], 0.0)
    ref = (adj @ jnp.concatenate([h1, h2], -1)) @ params["wout"] + params["bout"]

    assert out.shape == (N, OUT_DIM)
    assert jnp.allclose(out, ref, atol=3e-2, rtol=3e-2), float(jnp.max(jnp.abs(out - ref)))

    print("KERNEL_OK")
</pallas_src>

<mosaic_0001>
module attributes {stable_mosaic.version = 11 : i64} {
  func.func @conv1_fused_kernel(%arg0: i32, %arg1: i32, %arg2: memref<256x256xbf16, #tpu.memory_space<vmem>>, %arg3: memref<256x128xbf16, #tpu.memory_space<vmem>>, %arg4: memref<256x1xf32, #tpu.memory_space<vmem>>, %arg5: memref<1x128xf32, #tpu.memory_space<vmem>>, %arg6: memref<128x128xf32, #tpu.memory_space<vmem>>, %arg7: memref<256x128xbf16, #tpu.memory_space<vmem>>, %arg8: memref<256x128xbf16, #tpu.memory_space<vmem>>, %arg9: memref<256x128xf32, #tpu.memory_space<vmem>>) attributes {dimension_semantics = [#tpu.dimension_semantics<parallel>, #tpu.dimension_semantics<arbitrary>], iteration_bounds = array<i64: 1, 1>, scalar_prefetch = 0 : i64, scratch_operands = 1 : i64, tpu.core_type = #tpu.core_type<tc>, window_params = [{transform_indices = @transform_0, window_bounds = array<i64: 256, 256>}, {transform_indices = @transform_1, window_bounds = array<i64: 256, 128>}, {transform_indices = @transform_2, window_bounds = array<i64: 256, 1>}, {pipeline_mode = #tpu.pipeline_mode<synchronous>, transform_indices = @transform_3, window_bounds = array<i64: 1, 128>}, {pipeline_mode = #tpu.pipeline_mode<synchronous>, transform_indices = @transform_4, window_bounds = array<i64: 128, 128>}, {transform_indices = @transform_5, window_bounds = array<i64: 256, 128>}, {transform_indices = @transform_6, window_bounds = array<i64: 256, 128>}]} {
    %c0_i32 = arith.constant 0 : i32
    %0 = arith.cmpi eq, %arg1, %c0_i32 : i32
    %1 = arith.extui %0 : i1 to i32
    %c0_i32_0 = arith.constant 0 : i32
    %2 = arith.cmpi ne, %1, %c0_i32_0 : i32
    scf.if %2 {
      %cst_10 = arith.constant 0.000000e+00 : f32
      %12 = vector.broadcast %cst_10 : f32 to vector<256x128xf32>
      %c0_11 = arith.constant 0 : index
      %c0_12 = arith.constant 0 : index
      %13 = vector.load %arg9[%c0_11, %c0_12] : memref<256x128xf32, #tpu.memory_space<vmem>>, vector<256x128xf32>
      tpu.vector_store %arg9[%c0_11, %c0_12], %12 {strides = array<i32>} : memref<256x128xf32, #tpu.memory_space<vmem>>, vector<256x128xf32>,
    } else {
    }
    %c0 = arith.constant 0 : index
    %c0_1 = arith.constant 0 : index
    %3 = vector.load %arg9[%c0, %c0_1] : memref<256x128xf32, #tpu.memory_space<vmem>>, vector<256x128xf32>
    %c0_2 = arith.constant 0 : index
    %c0_3 = arith.constant 0 : index
    %4 = vector.load %arg2[%c0_2, %c0_3] : memref<256x256xbf16, #tpu.memory_space<vmem>>, vector<256x256xbf16>
    %c0_4 = arith.constant 0 : index
    %c0_5 = arith.constant 0 : index
    %5 = vector.load %arg3[%c0_4, %c0_5] : memref<256x128xbf16, #tpu.memory_space<vmem>>, vector<256x128xbf16>
    %cst = arith.constant dense<0.000000e+00> : vector<256x128xf32>
    %6 = tpu.matmul %4, %5, %cst {dimension_numbers = #tpu.dot_dimension_numbers<[1], [0], [0], [1], [0, 0, 1, 1], [], []>} : vector<256x256xbf16>, vector<256x128xbf16>, vector<256x128xf32> -> vector<256x128xf32>
    %7 = arith.addf %3, %6 : vector<256x128xf32>
    %c0_6 = arith.constant 0 : index
    %c0_7 = arith.constant 0 : index
    %8 = vector.load %arg9[%c0_6, %c0_7] : memref<256x128xf32, #tpu.memory_space<vmem>>, vector<256x128xf32>
    tpu.vector_store %arg9[%c0_6, %c0_7], %7 {strides = array<i32>} : memref<256x128xf32, #tpu.memory_space<vmem>>, vector<256x128xf32>,
    %c0_i32_8 = arith.constant 0 : i32
    %9 = arith.cmpi eq, %arg1, %c0_i32_8 : i32
    %10 = arith.extui %9 : i1 to i32
    %c0_i32_9 = arith.constant 0 : i32
    %11 = arith.cmpi ne, %10, %c0_i32_9 : i32
    scf.if %11 {
      %c0_10 = arith.constant 0 : index
      %c0_11 = arith.constant 0 : index
      %12 = vector.load %arg9[%c0_10, %c0_11] : memref<256x128xf32, #tpu.memory_space<vmem>>, vector<256x128xf32>
      %c0_12 = arith.constant 0 : index
      %c0_13 = arith.constant 0 : index
      %13 = vector.load %arg4[%c0_12, %c0_13] : memref<256x1xf32, #tpu.memory_space<vmem>>, vector<256x1xf32>
      %14 = vector.broadcast %13 : vector<256x1xf32> to vector<256x128xf32>
      %15 = arith.mulf %12, %14 : vector<256x128xf32>
      %c0_14 = arith.constant 0 : index
      %c0_15 = arith.constant 0 : index
      %16 = vector.load %arg5[%c0_14, %c0_15] : memref<1x128xf32, #tpu.memory_space<vmem>>, vector<1x128xf32>
      %17 = vector.broadcast %16 : vector<1x128xf32> to vector<256x128xf32>
      %18 = arith.addf %15, %17 : vector<256x128xf32>
      %cst_16 = arith.constant 0.000000e+00 : f32
      %19 = vector.broadcast %cst_16 : f32 to vector<256x128xf32>
      %20 = arith.maximumf %18, %19 : vector<256x128xf32>
      %21 = arith.truncf %20 : vector<256x128xf32> to vector<256x128xbf16>
      %c0_17 = arith.constant 0 : index
      %c0_18 = arith.constant 0 : index
      %22 = vector.load %arg7[%c0_17, %c0_18] : memref<256x128xbf16, #tpu.memory_space<vmem>>, vector<256x128xbf16>
      tpu.vector_store %arg7[%c0_17, %c0_18], %21 {strides = array<i32>} : memref<256x128xbf16, #tpu.memory_space<vmem>>, vector<256x128xbf16>,
      %c0_19 = arith.constant 0 : index
      %c0_20 = arith.constant 0 : index
      %23 = vector.load %arg4[%c0_19, %c0_20] : memref<256x1xf32, #tpu.memory_space<vmem>>, vector<256x1xf32>
      %c0_21 = arith.constant 0 : index
      %c0_22 = arith.constant 0 : index
      %24 = vector.load %arg6[%c0_21, %c0_22] : memref<128x128xf32, #tpu.memory_space<vmem>>, vector<128x128xf32>
      %cst_23 = arith.constant dense<0.000000e+00> : vector<256x128xf32>
      %25 = tpu.matmul %20, %24, %cst_23 {dimension_numbers = #tpu.dot_dimension_numbers<[1], [0], [0], [1], [0, 0, 1, 1], [], []>} : vector<256x128xf32>, vector<128x128xf32>, vector<256x128xf32> -> vector<256x128xf32>
      %26 = vector.broadcast %23 : vector<256x1xf32> to vector<256x128xf32>
      %27 = arith.mulf %26, %25 : vector<256x128xf32>
      %28 = arith.truncf %27 : vector<256x128xf32> to vector<256x128xbf16>
      %c0_24 = arith.constant 0 : index
      %c0_25 = arith.constant 0 : index
      %29 = vector.load %arg8[%c0_24, %c0_25] : memref<256x128xbf16, #tpu.memory_space<vmem>>, vector<256x128xbf16>
      tpu.vector_store %arg8[%c0_24, %c0_25], %28 {strides = array<i32>} : memref<256x128xbf16, #tpu.memory_space<vmem>>, vector<256x128xbf16>,
    } else {
    }
    return
  }
  func.func @transform_0(%arg0: i32, %arg1: i32) -> (i32, i32) {
    %c0_i32 = arith.constant 0 : i32
    return %arg0, %arg1 : i32, i32
  }
  func.func @transform_1(%arg0: i32, %arg1: i32) -> (i32, i32) {
    %c0_i32 = arith.constant 0 : i32
    %c0_i32_0 = arith.constant 0 : i32
    return %arg1, %c0_i32 : i32, i32
  }
  func.func @transform_2(%arg0: i32, %arg1: i32) -> (i32, i32) {
    %c0_i32 = arith.constant 0 : i32
    %c0_i32_0 = arith.constant 0 : i32
    return %arg0, %c0_i32 : i32, i32
  }
  func.func @transform_3(%arg0: i32, %arg1: i32) -> (i32, i32) {
    %c0_i32 = arith.constant 0 : i32
    %c0_i32_0 = arith.constant 0 : i32
    %c0_i32_1 = arith.constant 0 : i32
    return %c0_i32, %c0_i32_0 : i32, i32
  }
  func.func @transform_4(%arg0: i32, %arg1: i32) -> (i32, i32) {
    %c0_i32 = arith.constant 0 : i32
    %c0_i32_0 = arith.constant 0 : i32
    %c0_i32_1 = arith.constant 0 : i32
    return %c0_i32, %c0_i32_0 : i32, i32
  }
  func.func @transform_5(%arg0: i32, %arg1: i32) -> (i32, i32) {
    %c0_i32 = arith.constant 0 : i32
    %c0_i32_0 = arith.constant 0 : i32
    return %arg0, %c0_i32 : i32, i32
  }
  func.func @transform_6(%arg0: i32, %arg1: i32) -> (i32, i32) {
    %c0_i32 = arith.constant 0 : i32
    %c0_i32_0 = arith.constant 0 : i32
    return %arg0, %c0_i32 : i32, i32
  }
}

module attributes {stable_mosaic.version = 11 : i64} {
  func.func @conv2_jk_kernel(%arg0: i32, %arg1: i32, %arg2: memref<256x256xbf16, #tpu.memory_space<vmem>>, %arg3: memref<256x128xbf16, #tpu.memory_space<vmem>>, %arg4: memref<256x1xf32, #tpu.memory_space<vmem>>, %arg5: memref<1x128xf32, #tpu.memory_space<vmem>>, %arg6: memref<256x128xbf16, #tpu.memory_space<vmem>>, %arg7: memref<128x128xf32, #tpu.memory_space<vmem>>, %arg8: memref<128x128xf32, #tpu.memory_space<vmem>>, %arg9: memref<256x128xbf16, #tpu.memory_space<vmem>>, %arg10: memref<256x128xf32, #tpu.memory_space<vmem>>) attributes {dimension_semantics = [#tpu.dimension_semantics<parallel>, #tpu.dimension_semantics<arbitrary>], iteration_bounds = array<i64: 1, 1>, scalar_prefetch = 0 : i64, scratch_operands = 1 : i64, tpu.core_type = #tpu.core_type<tc>, window_params = [{transform_indices = @transform_0, window_bounds = array<i64: 256, 256>}, {transform_indices = @transform_1, window_bounds = array<i64: 256, 128>}, {transform_indices = @transform_2, window_bounds = array<i64: 256, 1>}, {pipeline_mode = #tpu.pipeline_mode<synchronous>, transform_indices = @transform_3, window_bounds = array<i64: 1, 128>}, {transform_indices = @transform_4, window_bounds = array<i64: 256, 128>}, {pipeline_mode = #tpu.pipeline_mode<synchronous>, transform_indices = @transform_5, window_bounds = array<i64: 128, 128>}, {pipeline_mode = #tpu.pipeline_mode<synchronous>, transform_indices = @transform_6, window_bounds = array<i64: 128, 128>}, {transform_indices = @transform_7, window_bounds = array<i64: 256, 128>}]} {
    %c0_i32 = arith.constant 0 : i32
    %0 = arith.cmpi eq, %arg1, %c0_i32 : i32
    %1 = arith.extui %0 : i1 to i32
    %c0_i32_0 = arith.constant 0 : i32
    %2 = arith.cmpi ne, %1, %c0_i32_0 : i32
    scf.if %2 {
      %cst_10 = arith.constant 0.000000e+00 : f32
      %12 = vector.broadcast %cst_10 : f32 to vector<256x128xf32>
      %c0_11 = arith.constant 0 : index
      %c0_12 = arith.constant 0 : index
      %13 = vector.load %arg10[%c0_11, %c0_12] : memref<256x128xf32, #tpu.memory_space<vmem>>, vector<256x128xf32>
      tpu.vector_store %arg10[%c0_11, %c0_12], %12 {strides = array<i32>} : memref<256x128xf32, #tpu.memory_space<vmem>>, vector<256x128xf32>,
    } else {
    }
    %c0 = arith.constant 0 : index
    %c0_1 = arith.constant 0 : index
    %3 = vector.load %arg10[%c0, %c0_1] : memref<256x128xf32, #tpu.memory_space<vmem>>, vector<256x128xf32>
    %c0_2 = arith.constant 0 : index
    %c0_3 = arith.constant 0 : index
    %4 = vector.load %arg2[%c0_2, %c0_3] : memref<256x256xbf16, #tpu.memory_space<vmem>>, vector<256x256xbf16>
    %c0_4 = arith.constant 0 : index
    %c0_5 = arith.constant 0 : index
    %5 = vector.load %arg3[%c0_4, %c0_5] : memref<256x128xbf16, #tpu.memory_space<vmem>>, vector<256x128xbf16>
    %cst = arith.constant dense<0.000000e+00> : vector<256x128xf32>
    %6 = tpu.matmul %4, %5, %cst {dimension_numbers = #tpu.dot_dimension_numbers<[1], [0], [0], [1], [0, 0, 1, 1], [], []>} : vector<256x256xbf16>, vector<256x128xbf16>, vector<256x128xf32> -> vector<256x128xf32>
    %7 = arith.addf %3, %6 : vector<256x128xf32>
    %c0_6 = arith.constant 0 : index
    %c0_7 = arith.constant 0 : index
    %8 = vector.load %arg10[%c0_6, %c0_7] : memref<256x128xf32, #tpu.memory_space<vmem>>, vector<256x128xf32>
    tpu.vector_store %arg10[%c0_6, %c0_7], %7 {strides = array<i32>} : memref<256x128xf32, #tpu.memory_space<vmem>>, vector<256x128xf32>,
    %c0_i32_8 = arith.constant 0 : i32
    %9 = arith.cmpi eq, %arg1, %c0_i32_8 : i32
    %10 = arith.extui %9 : i1 to i32
    %c0_i32_9 = arith.constant 0 : i32
    %11 = arith.cmpi ne, %10, %c0_i32_9 : i32
    scf.if %11 {
      %c0_10 = arith.constant 0 : index
      %c0_11 = arith.constant 0 : index
      %12 = vector.load %arg10[%c0_10, %c0_11] : memref<256x128xf32, #tpu.memory_space<vmem>>, vector<256x128xf32>
      %c0_12 = arith.constant 0 : index
      %c0_13 = arith.constant 0 : index
      %13 = vector.load %arg4[%c0_12, %c0_13] : memref<256x1xf32, #tpu.memory_space<vmem>>, vector<256x1xf32>
      %14 = vector.broadcast %13 : vector<256x1xf32> to vector<256x128xf32>
      %15 = arith.mulf %12, %14 : vector<256x128xf32>
      %c0_14 = arith.constant 0 : index
      %c0_15 = arith.constant 0 : index
      %16 = vector.load %arg5[%c0_14, %c0_15] : memref<1x128xf32, #tpu.memory_space<vmem>>, vector<1x128xf32>
      %17 = vector.broadcast %16 : vector<1x128xf32> to vector<256x128xf32>
      %18 = arith.addf %15, %17 : vector<256x128xf32>
      %cst_16 = arith.constant 0.000000e+00 : f32
      %19 = vector.broadcast %cst_16 : f32 to vector<256x128xf32>
      %20 = arith.maximumf %18, %19 : vector<256x128xf32>
      %c0_17 = arith.constant 0 : index
      %c0_18 = arith.constant 0 : index
      %21 = vector.load %arg6[%c0_17, %c0_18] : memref<256x128xbf16, #tpu.memory_space<vmem>>, vector<256x128xbf16>
      %22 = arith.extf %21 : vector<256x128xbf16> to vector<256x128xf32>
      %c0_19 = arith.constant 0 : index
      %c0_20 = arith.constant 0 : index
      %23 = vector.load %arg7[%c0_19, %c0_20] : memref<128x128xf32, #tpu.memory_space<vmem>>, vector<128x128xf32>
      %cst_21 = arith.constant dense<0.000000e+00> : vector<256x128xf32>
      %24 = tpu.matmul %22, %23, %cst_21 {dimension_numbers = #tpu.dot_dimension_numbers<[1], [0], [0], [1], [0, 0, 1, 1], [], []>} : vector<256x128xf32>, vector<128x128xf32>, vector<256x128xf32> -> vector<256x128xf32>
      %c0_22 = arith.constant 0 : index
      %c0_23 = arith.constant 0 : index
      %25 = vector.load %arg8[%c0_22, %c0_23] : memref<128x128xf32, #tpu.memory_space<vmem>>, vector<128x128xf32>
      %cst_24 = arith.constant dense<0.000000e+00> : vector<256x128xf32>
      %26 = tpu.matmul %20, %25, %cst_24 {dimension_numbers = #tpu.dot_dimension_numbers<[1], [0], [0], [1], [0, 0, 1, 1], [], []>} : vector<256x128xf32>, vector<128x128xf32>, vector<256x128xf32> -> vector<256x128xf32>
      %27 = arith.addf %24, %26 : vector<256x128xf32>
      %28 = arith.truncf %27 : vector<256x128xf32> to vector<256x128xbf16>
      %c0_25 = arith.constant 0 : index
      %c0_26 = arith.constant 0 : index
      %29 = vector.load %arg9[%c0_25, %c0_26] : memref<256x128xbf16, #tpu.memory_space<vmem>>, vector<256x128xbf16>
      tpu.vector_store %arg9[%c0_25, %c0_26], %28 {strides = array<i32>} : memref<256x128xbf16, #tpu.memory_space<vmem>>, vector<256x128xbf16>,
    } else {
    }
    return
  }
  func.func @transform_0(%arg0: i32, %arg1: i32) -> (i32, i32) {
    %c0_i32 = arith.constant 0 : i32
    return %arg0, %arg1 : i32, i32
  }
  func.func @transform_1(%arg0: i32, %arg1: i32) -> (i32, i32) {
    %c0_i32 = arith.constant 0 : i32
    %c0_i32_0 = arith.constant 0 : i32
    return %arg1, %c0_i32 : i32, i32
  }
  func.func @transform_2(%arg0: i32, %arg1: i32) -> (i32, i32) {
    %c0_i32 = arith.constant 0 : i32
    %c0_i32_0 = arith.constant 0 : i32
    return %arg0, %c0_i32 : i32, i32
  }
  func.func @transform_3(%arg0: i32, %arg1: i32) -> (i32, i32) {
    %c0_i32 = arith.constant 0 : i32
    %c0_i32_0 = arith.constant 0 : i32
    %c0_i32_1 = arith.constant 0 : i32
    return %c0_i32, %c0_i32_0 : i32, i32
  }
  func.func @transform_4(%arg0: i32, %arg1: i32) -> (i32, i32) {
    %c0_i32 = arith.constant 0 : i32
    %c0_i32_0 = arith.constant 0 : i32
    return %arg0, %c0_i32 : i32, i32
  }
  func.func @transform_5(%arg0: i32, %arg1: i32) -> (i32, i32) {
    %c0_i32 = arith.constant 0 : i32
    %c0_i32_0 = arith.constant 0 : i32
    %c0_i32_1 = arith.constant 0 : i32
    return %c0_i32, %c0_i32_0 : i32, i32
  }
  func.func @transform_6(%arg0: i32, %arg1: i32) -> (i32, i32) {
    %c0_i32 = arith.constant 0 : i32
    %c0_i32_0 = arith.constant 0 : i32
    %c0_i32_1 = arith.constant 0 : i32
    return %c0_i32, %c0_i32_0 : i32, i32
  }
  func.func @transform_7(%arg0: i32, %arg1: i32) -> (i32, i32) {
    %c0_i32 = arith.constant 0 : i32
    %c0_i32_0 = arith.constant 0 : i32
    return %arg0, %c0_i32 : i32, i32
  }
}

module attributes {stable_mosaic.version = 11 : i64} {
  func.func @out_agg_kernel(%arg0: i32, %arg1: i32, %arg2: memref<256x256xbf16, #tpu.memory_space<vmem>>, %arg3: memref<256x128xbf16, #tpu.memory_space<vmem>>, %arg4: memref<1x128xf32, #tpu.memory_space<vmem>>, %arg5: memref<256x128xf32, #tpu.memory_space<vmem>>, %arg6: memref<256x128xf32, #tpu.memory_space<vmem>>) attributes {dimension_semantics = [#tpu.dimension_semantics<parallel>, #tpu.dimension_semantics<arbitrary>], iteration_bounds = array<i64: 1, 1>, scalar_prefetch = 0 : i64, scratch_operands = 1 : i64, tpu.core_type = #tpu.core_type<tc>, window_params = [{transform_indices = @transform_0, window_bounds = array<i64: 256, 256>}, {transform_indices = @transform_1, window_bounds = array<i64: 256, 128>}, {pipeline_mode = #tpu.pipeline_mode<synchronous>, transform_indices = @transform_2, window_bounds = array<i64: 1, 128>}, {transform_indices = @transform_3, window_bounds = array<i64: 256, 128>}]} {
    %c0_i32 = arith.constant 0 : i32
    %0 = arith.cmpi eq, %arg1, %c0_i32 : i32
    %1 = arith.extui %0 : i1 to i32
    %c0_i32_0 = arith.constant 0 : i32
    %2 = arith.cmpi ne, %1, %c0_i32_0 : i32
    scf.if %2 {
      %cst_10 = arith.constant 0.000000e+00 : f32
      %12 = vector.broadcast %cst_10 : f32 to vector<256x128xf32>
      %c0_11 = arith.constant 0 : index
      %c0_12 = arith.constant 0 : index
      %13 = vector.load %arg6[%c0_11, %c0_12] : memref<256x128xf32, #tpu.memory_space<vmem>>, vector<256x128xf32>
      tpu.vector_store %arg6[%c0_11, %c0_12], %12 {strides = array<i32>} : memref<256x128xf32, #tpu.memory_space<vmem>>, vector<256x128xf32>,
    } else {
    }
    %c0 = arith.constant 0 : index
    %c0_1 = arith.constant 0 : index
    %3 = vector.load %arg6[%c0, %c0_1] : memref<256x128xf32, #tpu.memory_space<vmem>>, vector<256x128xf32>
    %c0_2 = arith.constant 0 : index
    %c0_3 = arith.constant 0 : index
    %4 = vector.load %arg2[%c0_2, %c0_3] : memref<256x256xbf16, #tpu.memory_space<vmem>>, vector<256x256xbf16>
    %c0_4 = arith.constant 0 : index
    %c0_5 = arith.constant 0 : index
    %5 = vector.load %arg3[%c0_4, %c0_5] : memref<256x128xbf16, #tpu.memory_space<vmem>>, vector<256x128xbf16>
    %cst = arith.constant dense<0.000000e+00> : vector<256x128xf32>
    %6 = tpu.matmul %4, %5, %cst {dimension_numbers = #tpu.dot_dimension_numbers<[1], [0], [0], [1], [0, 0, 1, 1], [], []>} : vector<256x256xbf16>, vector<256x128xbf16>, vector<256x128xf32> -> vector<256x128xf32>
    %7 = arith.addf %3, %6 : vector<256x128xf32>
    %c0_6 = arith.constant 0 : index
    %c0_7 = arith.constant 0 : index
    %8 = vector.load %arg6[%c0_6, %c0_7] : memref<256x128xf32, #tpu.memory_space<vmem>>, vector<256x128xf32>
    tpu.vector_store %arg6[%c0_6, %c0_7], %7 {strides = array<i32>} : memref<256x128xf32, #tpu.memory_space<vmem>>, vector<256x128xf32>,
    %c0_i32_8 = arith.constant 0 : i32
    %9 = arith.cmpi eq, %arg1, %c0_i32_8 : i32
    %10 = arith.extui %9 : i1 to i32
    %c0_i32_9 = arith.constant 0 : i32
    %11 = arith.cmpi ne, %10, %c0_i32_9 : i32
    scf.if %11 {
      %c0_10 = arith.constant 0 : index
      %c0_11 = arith.constant 0 : index
      %12 = vector.load %arg6[%c0_10, %c0_11] : memref<256x128xf32, #tpu.memory_space<vmem>>, vector<256x128xf32>
      %c0_12 = arith.constant 0 : index
      %c0_13 = arith.constant 0 : index
      %13 = vector.load %arg4[%c0_12, %c0_13] : memref<1x128xf32, #tpu.memory_space<vmem>>, vector<1x128xf32>
      %14 = vector.broadcast %13 : vector<1x128xf32> to vector<256x128xf32>
      %15 = arith.addf %12, %14 : vector<256x128xf32>
      %c0_14 = arith.constant 0 : index
      %c0_15 = arith.constant 0 : index
      %16 = vector.load %arg5[%c0_14, %c0_15] : memref<256x128xf32, #tpu.memory_space<vmem>>, vector<256x128xf32>
      tpu.vector_store %arg5[%c0_14, %c0_15], %15 {strides = array<i32>} : memref<256x128xf32, #tpu.memory_space<vmem>>, vector<256x128xf32>,
    } else {
    }
    return
  }
  func.func @transform_0(%arg0: i32, %arg1: i32) -> (i32, i32) {
    %c0_i32 = arith.constant 0 : i32
    return %arg0, %arg1 : i32, i32
  }
  func.func @transform_1(%arg0: i32, %arg1: i32) -> (i32, i32) {
    %c0_i32 = arith.constant 0 : i32
    %c0_i32_0 = arith.constant 0 : i32
    return %arg1, %c0_i32 : i32, i32
  }
  func.func @transform_2(%arg0: i32, %arg1: i32) -> (i32, i32) {
    %c0_i32 = arith.constant 0 : i32
    %c0_i32_0 = arith.constant 0 : i32
    %c0_i32_1 = arith.constant 0 : i32
    return %c0_i32, %c0_i32_0 : i32, i32
  }
  func.func @transform_3(%arg0: i32, %arg1: i32) -> (i32, i32) {
    %c0_i32 = arith.constant 0 : i32
    %c0_i32_0 = arith.constant 0 : i32
    return %arg0, %c0_i32 : i32, i32
  }
}

</mosaic_0001>

<bundles_post_ra>
// kernel: jknet_forward.5
= control target key start
LH: loop header
LB: loop body
LE: loop exit
PB: predicated region body
PF: predicated region fallthrough
CT: control target
= control target key end

     0   :  { %s1276_s1 = inlined_call_operand.vmem [shape: bf16[256,128], index: 1, kind: input, shape index: {}]   ;;  %s1277_s0 = inlined_call_operand.vmem [shape: bf16[256,256], index: 0, kind: input, shape index: {}]   ;;  %s1278_s2 = inlined_call_operand.vmem [shape: f32[1,128], index: 2, kind: input, shape index: {}]   ;;  %s1279_s3 = inlined_call_operand.vmem [shape: f32[256,128], index: 3, kind: output, shape index: {}]  }
   0x1   :  { %v915_v0 = vld [vmem:[%s1276_s1 + $0x40] sm:$0xff]   ;;  %v917_v2 = vld [vmem:[%s1276_s1 + $0x48] sm:$0xff]   ;;  %v919_v4 = vld [vmem:[%s1276_s1 + $0x50] sm:$0xff]  }
   0x2   :  { %v916_v1 = vld [vmem:[%s1276_s1] sm:$0xff]   ;;  %787 = vmatprep.subr.bf16.mxu0 %v915_v0  ;;  %899 = vmatprep.subr.bf16.mxu1 %v915_v0  ;;  %v918_v3 = vld [vmem:[%s1276_s1 + $0x8] sm:$0xff]   ;;  %v920_v5 = vld [vmem:[%s1276_s1 + $0x10] sm:$0xff]  }
   0x3   :  { %788 = vmatpush3.bf16.msra.mxu0 %v916_v1  ;;  %907 = vmatpush3.bf16.msra.mxu1 %v916_v1  ;;  %v921_v6 = vld [vmem:[%s1276_s1 + $0x58] sm:$0xff]   ;;  %v923_v8 = vld [vmem:[%s1276_s1 + $0x60] sm:$0xff]   ;;  %v925_v10 = vld [vmem:[%s1276_s1 + $0x68] sm:$0xff]  }
   0x4   :  { %789 = vmatprep.subr.bf16.mxu0 %v917_v2  ;;  %900 = vmatprep.subr.bf16.mxu1 %v917_v2  ;;  %v922_v7 = vld [vmem:[%s1276_s1 + $0x18] sm:$0xff]   ;;  %v924_v9 = vld [vmem:[%s1276_s1 + $0x20] sm:$0xff]   ;;  %v926_v13 = vld [vmem:[%s1276_s1 + $0x28] sm:$0xff]  }
   0x5   :  { %v933_v11 = vld [vmem:[%s1277_s0 + $0x4] ss:$8 sps:$4 sm:$0xff]   ;;  %v927_v14 = vld [vmem:[%s1276_s1 + $0x70] sm:$0xff]   ;;  %v929_v16 = vld [vmem:[%s1276_s1 + $0x78] sm:$0xff]  }
   0x6   :  { %v936_v12 = vld [vmem:[%s1277_s0 + $0x84] ss:$8 sps:$4 sm:$0xff]   ;;  %435 = vmatprep.mubr.bf16.mxu0 %v933_v11  ;;  %v928_v15 = vld [vmem:[%s1276_s1 + $0x30] sm:$0xff]   ;;  %v930_v17 = vld [vmem:[%s1276_s1 + $0x38] sm:$0xff]  }
   0x7   :  { %790 = vmatpush3.bf16.msra.mxu0 %v918_v3  ;;  %908 = vmatpush3.bf16.msra.mxu1 %v918_v3  ;;  %v931_v18 = vld [vmem:[%s1277_s0] ss:$8 sps:$4 sm:$0xff]   ;;  %v937_v20 = vld [vmem:[%s1277_s0 + $0x14] ss:$8 sps:$4 sm:$0xff]   ;;  %v941_v22 = vld [vmem:[%s1277_s0 + $0x10] ss:$8 sps:$4 sm:$0xff]  }
   0x8   :  { %791 = vmatprep.subr.bf16.mxu0 %v919_v4  ;;  %901 = vmatprep.subr.bf16.mxu1 %v919_v4  ;;  %v934_v19 = vld [vmem:[%s1277_s0 + $0x80] ss:$8 sps:$4 sm:$0xff]   ;;  %v939_v21 = vld [vmem:[%s1277_s0 + $0x94] ss:$8 sps:$4 sm:$0xff]   ;;  %v942_v23 = vld [vmem:[%s1277_s0 + $0x90] ss:$8 sps:$4 sm:$0xff]  }
   0x9   :  { %499 = vmatprep.mubr.bf16.mxu1 %v936_v12  ;;  %v943_v24 = vld [vmem:[%s1277_s0 + $0x24] ss:$8 sps:$4 sm:$0xff]   ;;  %v947_v26 = vld [vmem:[%s1277_s0 + $0x20] ss:$8 sps:$4 sm:$0xff]   ;;  %v949_v28 = vld [vmem:[%s1277_s0 + $0x34] ss:$8 sps:$4 sm:$0xff]  }
   0xa   :  { %v945_v25 = vld [vmem:[%s1277_s0 + $0xa4] ss:$8 sps:$4 sm:$0xff]   ;;  %v948_v27 = vld [vmem:[%s1277_s0 + $0xa0] ss:$8 sps:$4 sm:$0xff]   ;;  %v951_v29 = vld [vmem:[%s1277_s0 + $0xb4] ss:$8 sps:$4 sm:$0xff]  }
   0xb   :  { %792 = vmatpush3.bf16.msra.mxu0 %v920_v5  ;;  %909 = vmatpush3.bf16.msra.mxu1 %v920_v5  ;;  %v953_v30 = vld [vmem:[%s1277_s0 + $0x30] ss:$8 sps:$4 sm:$0xff]   ;;  %v955_v32 = vld [vmem:[%s1277_s0 + $0x44] ss:$8 sps:$4 sm:$0xff]   ;;  %v959_v34 = vld [vmem:[%s1277_s0 + $0x40] ss:$8 sps:$4 sm:$0xff]  }
   0xc   :  { %793 = vmatprep.subr.bf16.mxu0 %v921_v6  ;;  %902 = vmatprep.subr.bf16.mxu1 %v921_v6  ;;  %v954_v31 = vld [vmem:[%s1277_s0 + $0xb0] ss:$8 sps:$4 sm:$0xff]   ;;  %v957_v33 = vld [vmem:[%s1277_s0 + $0xc4] ss:$8 sps:$4 sm:$0xff]   ;;  %v960_v35 = vld [vmem:[%s1277_s0 + $0xc0] ss:$8 sps:$4 sm:$0xff]  }
   0xd   :  { %v961_v36 = vld [vmem:[%s1277_s0 + $0x54] ss:$8 sps:$4 sm:$0xff]   ;;  %v965_v38 = vld [vmem:[%s1277_s0 + $0x50] ss:$8 sps:$4 sm:$0xff]   ;;  %v967_v40 = vld [vmem:[%s1277_s0 + $0x64] ss:$8 sps:$4 sm:$0xff]  }
   0xe   :  { %v963_v37 = vld [vmem:[%s1277_s0 + $0xd4] ss:$8 sps:$4 sm:$0xff]   ;;  %v966_v39 = vld [vmem:[%s1277_s0 + $0xd0] ss:$8 sps:$4 sm:$0xff]   ;;  %v969_v41 = vld [vmem:[%s1277_s0 + $0xe4] ss:$8 sps:$4 sm:$0xff]  }
   0xf   :  { %794 = vmatpush3.bf16.msra.mxu0 %v922_v7  ;;  %910 = vmatpush3.bf16.msra.mxu1 %v922_v7  ;;  %v971_v42 = vld [vmem:[%s1277_s0 + $0x60] ss:$8 sps:$4 sm:$0xff]   ;;  %v973_v44 = vld [vmem:[%s1277_s0 + $0x74] ss:$8 sps:$4 sm:$0xff]   ;;  %v977_v46 = vld [vmem:[%s1277_s0 + $0x70] ss:$8 sps:$4 sm:$0xff]  }
  0x10   :  { %795 = vmatprep.subr.bf16.mxu0 %v923_v8  ;;  %903 = vmatprep.subr.bf16.mxu1 %v923_v8  ;;  %v972_v43 = vld [vmem:[%s1277_s0 + $0xe0] ss:$8 sps:$4 sm:$0xff]   ;;  %v975_v45 = vld [vmem:[%s1277_s0 + $0xf4] ss:$8 sps:$4 sm:$0xff]   ;;  %v978_v47 = vld [vmem:[%s1277_s0 + $0xf0] ss:$8 sps:$4 sm:$0xff]  }
  0x11   :  { %v1146_v51 = vld [vmem:[%s1278_s2] ss:$0 sm:$0xff] }
  0x13   :  { %796 = vmatpush3.bf16.msra.mxu0 %v924_v9  ;;  %911 = vmatpush3.bf16.msra.mxu1 %v924_v9 }
  0x14   :  { %797 = vmatprep.subr.bf16.mxu0 %v925_v10  ;;  %904 = vmatprep.subr.bf16.mxu1 %v925_v10 }
  0x17   :  { %798 = vmatpush3.bf16.msra.mxu0 %v926_v13  ;;  %912 = vmatpush3.bf16.msra.mxu1 %v926_v13 }
  0x18   :  { %799 = vmatprep.subr.bf16.mxu0 %v927_v14  ;;  %905 = vmatprep.subr.bf16.mxu1 %v927_v14 }
  0x1b   :  { %800 = vmatpush3.bf16.msra.mxu0 %v928_v15  ;;  %913 = vmatpush3.bf16.msra.mxu1 %v928_v15 }
  0x1c   :  { %801 = vmatprep.subr.bf16.mxu0 %v929_v16  ;;  %906 = vmatprep.subr.bf16.mxu1 %v929_v16 }
  0x1f   :  { %802 = vmatpush3.bf16.msra.mxu0 %v930_v17  ;;  %914 = vmatpush3.bf16.msra.mxu1 %v930_v17 }
  0x22   :  { %436 = vmatmul.mubr.bf16.vlgmr.msra.gmra.mrb[0].mxu0 %v931_v18  ;;  %500 = vmatmul.mubr.bf16.vlgmr.msra.gmra.mrb[0].mxu1 %v934_v19 }
  0x23   :  { %443 = vmatprep.mubr.bf16.mxu0 %v937_v20  ;;  %507 = vmatprep.mubr.bf16.mxu1 %v939_v21 }
  0x2a   :  { %444 = vmatmul.mubr.bf16.gmra.mrb[4].mxu0 %v941_v22  ;;  %508 = vmatmul.mubr.bf16.gmra.mrb[4].mxu1 %v942_v23 }
  0x2b   :  { %451 = vmatprep.mubr.bf16.mxu0 %v943_v24  ;;  %515 = vmatprep.mubr.bf16.mxu1 %v945_v25 }
  0x32   :  { %452 = vmatmul.mubr.bf16.gmra.mrb[8].mxu0 %v947_v26  ;;  %516 = vmatmul.mubr.bf16.gmra.mrb[8].mxu1 %v948_v27 }
  0x33   :  { %459 = vmatprep.mubr.bf16.mxu0 %v949_v28  ;;  %523 = vmatprep.mubr.bf16.mxu1 %v951_v29 }
  0x3a   :  { %460 = vmatmul.mubr.bf16.gmra.mrb[12].mxu0 %v953_v30  ;;  %524 = vmatmul.mubr.bf16.gmra.mrb[12].mxu1 %v954_v31 }
  0x3b   :  { %467 = vmatprep.mubr.bf16.mxu0 %v955_v32  ;;  %531 = vmatprep.mubr.bf16.mxu1 %v957_v33 }
  0x42   :  { %468 = vmatmul.mubr.bf16.gmra.mrb[16].mxu0 %v959_v34  ;;  %532 = vmatmul.mubr.bf16.gmra.mrb[16].mxu1 %v960_v35 }
  0x43   :  { %475 = vmatprep.mubr.bf16.mxu0 %v961_v36  ;;  %539 = vmatprep.mubr.bf16.mxu1 %v963_v37 }
  0x4a   :  { %476 = vmatmul.mubr.bf16.gmra.mrb[20].mxu0 %v965_v38  ;;  %540 = vmatmul.mubr.bf16.gmra.mrb[20].mxu1 %v966_v39 }
  0x4b   :  { %483 = vmatprep.mubr.bf16.mxu0 %v967_v40  ;;  %547 = vmatprep.mubr.bf16.mxu1 %v969_v41 }
  0x52   :  { %484 = vmatmul.mubr.bf16.gmra.mrb[24].mxu0 %v971_v42  ;;  %548 = vmatmul.mubr.bf16.gmra.mrb[24].mxu1 %v972_v43 }
  0x53   :  { %491 = vmatprep.mubr.bf16.mxu0 %v973_v44  ;;  %555 = vmatprep.mubr.bf16.mxu1 %v975_v45 }
  0x5a   :  { %492 = vmatmul.mubr.bf16.gmra.mrb[28].mxu0 %v977_v46  ;;  %556 = vmatmul.mubr.bf16.gmra.mrb[28].mxu1 %v978_v47 }
  0xf5   :  { %v803_v48 = vpop.f32.mrb[0].mxu0  ;;  %v851_v49 = vpop.f32.mrb[0].mxu1 }
  0xf6   :  { %v804_v50 = vpop.f32.mrb[1].mxu0  ;;  %v852_v52 = vpop.f32.mrb[1].mxu1 }
  0xf7   :  { %v805_v53 = vadd.f32 %v804_v50, %v803_v48  ;;  %v853_v54 = vadd.f32 %v852_v52, %v851_v49  ;;  %v806_v55 = vpop.f32.mrb[2].mxu0  ;;  %v854_v56 = vpop.f32.mrb[2].mxu1 }
  0xf8   :  { %v807_v57 = vpop.f32.mrb[3].mxu0  ;;  %v855_v58 = vpop.f32.mrb[3].mxu1 }
  0xf9   :  { %v670_v59 = vadd.f32 %v805_v53, %v1146_v51  ;;  %v686_v60 = vadd.f32 %v853_v54, %v1146_v51  ;;  %v808_v61 = vadd.f32 %v807_v57, %v806_v55  ;;  %v856_v62 = vadd.f32 %v855_v58, %v854_v56 }
  0xfb   :  { %702 = vst [vmem:[%s1279_s3] sm:$0xff] %v670_v59  ;;  %718 = vst [vmem:[%s1279_s3 + $0x80] sm:$0xff] %v686_v60  ;;  %v671_v63 = vadd.f32 %v808_v61, %v1146_v51  ;;  %v687_v0 = vadd.f32 %v856_v62, %v1146_v51 }
  0xfd   :  { %703 = vst [vmem:[%s1279_s3 + $0x8] sm:$0xff] %v671_v63  ;;  %719 = vst [vmem:[%s1279_s3 + $0x88] sm:$0xff] %v687_v0  ;;  %v809_v1 = vpop.f32.mrb[4].mxu0  ;;  %v857_v2 = vpop.f32.mrb[4].mxu1 }
  0xfe   :  { %v810_v3 = vpop.f32.mrb[5].mxu0  ;;  %v858_v4 = vpop.f32.mrb[5].mxu1 }
  0xff   :  { %v811_v5 = vadd.f32 %v810_v3, %v809_v1  ;;  %v859_v6 = vadd.f32 %v858_v4, %v857_v2  ;;  %v812_v7 = vpop.f32.mrb[6].mxu0  ;;  %v860_v8 = vpop.f32.mrb[6].mxu1 }
 0x100   :  { %v813_v9 = vpop.f32.mrb[7].mxu0  ;;  %v861_v10 = vpop.f32.mrb[7].mxu1 }
 0x101   :  { %v672_v11 = vadd.f32 %v811_v5, %v1146_v51  ;;  %v688_v12 = vadd.f32 %v859_v6, %v1146_v51  ;;  %v814_v13 = vadd.f32 %v813_v9, %v812_v7  ;;  %v862_v14 = vadd.f32 %v861_v10, %v860_v8 }
 0x103   :  { %704 = vst [vmem:[%s1279_s3 + $0x10] sm:$0xff] %v672_v11  ;;  %720 = vst [vmem:[%s1279_s3 + $0x90] sm:$0xff] %v688_v12  ;;  %v673_v15 = vadd.f32 %v814_v13, %v1146_v51  ;;  %v689_v16 = vadd.f32 %v862_v14, %v1146_v51 }
 0x105   :  { %705 = vst [vmem:[%s1279_s3 + $0x18] sm:$0xff] %v673_v15  ;;  %721 = vst [vmem:[%s1279_s3 + $0x98] sm:$0xff] %v689_v16  ;;  %v815_v17 = vpop.f32.mrb[8].mxu0  ;;  %v863_v18 = vpop.f32.mrb[8].mxu1 }
 0x106   :  { %v816_v19 = vpop.f32.mrb[9].mxu0  ;;  %v864_v20 = vpop.f32.mrb[9].mxu1 }
 0x107   :  { %v817_v21 = vadd.f32 %v816_v19, %v815_v17  ;;  %v865_v22 = vadd.f32 %v864_v20, %v863_v18  ;;  %v818_v23 = vpop.f32.mrb[10].mxu0  ;;  %v866_v24 = vpop.f32.mrb[10].mxu1 }
 0x108   :  { %v819_v25 = vpop.f32.mrb[11].mxu0  ;;  %v867_v26 = vpop.f32.mrb[11].mxu1 }
 0x109   :  { %v674_v27 = vadd.f32 %v817_v21, %v1146_v51  ;;  %v690_v28 = vadd.f32 %v865_v22, %v1146_v51  ;;  %v820_v29 = vadd.f32 %v819_v25, %v818_v23  ;;  %v868_v30 = vadd.f32 %v867_v26, %v866_v24 }
 0x10b   :  { %706 = vst [vmem:[%s1279_s3 + $0x20] sm:$0xff] %v674_v27  ;;  %722 = vst [vmem:[%s1279_s3 + $0xa0] sm:$0xff] %v690_v28  ;;  %v675_v31 = vadd.f32 %v820_v29, %v1146_v51  ;;  %v691_v32 = vadd.f32 %v868_v30, %v1146_v51 }
 0x10d   :  { %707 = vst [vmem:[%s1279_s3 + $0x28] sm:$0xff] %v675_v31  ;;  %723 = vst [vmem:[%s1279_s3 + $0xa8] sm:$0xff] %v691_v32  ;;  %v821_v33 = vpop.f32.mrb[12].mxu0  ;;  %v869_v34 = vpop.f32.mrb[12].mxu1 }
 0x10e   :  { %v822_v35 = vpop.f32.mrb[13].mxu0  ;;  %v870_v36 = vpop.f32.mrb[13].mxu1 }
 0x10f   :  { %v823_v37 = vadd.f32 %v822_v35, %v821_v33  ;;  %v871_v38 = vadd.f32 %v870_v36, %v869_v34  ;;  %v824_v39 = vpop.f32.mrb[14].mxu0  ;;  %v872_v40 = vpop.f32.mrb[14].mxu1 }
 0x110   :  { %v825_v41 = vpop.f32.mrb[15].mxu0  ;;  %v873_v42 = vpop.f32.mrb[15].mxu1 }
 0x111   :  { %v676_v43 = vadd.f32 %v823_v37, %v1146_v51  ;;  %v692_v44 = vadd.f32 %v871_v38, %v1146_v51  ;;  %v826_v45 = vadd.f32 %v825_v41, %v824_v39  ;;  %v874_v46 = vadd.f32 %v873_v42, %v872_v40 }
 0x113   :  { %708 = vst [vmem:[%s1279_s3 + $0x30] sm:$0xff] %v676_v43  ;;  %724 = vst [vmem:[%s1279_s3 + $0xb0] sm:$0xff] %v692_v44  ;;  %v677_v47 = vadd.f32 %v826_v45, %v1146_v51  ;;  %v693_v48 = vadd.f32 %v874_v46, %v1146_v51 }
 0x115   :  { %709 = vst [vmem:[%s1279_s3 + $0x38] sm:$0xff] %v677_v47  ;;  %725 = vst [vmem:[%s1279_s3 + $0xb8] sm:$0xff] %v693_v48  ;;  %v827_v49 = vpop.f32.mrb[16].mxu0  ;;  %v875_v50 = vpop.f32.mrb[16].mxu1 }
 0x116   :  { %v828_v52 = vpop.f32.mrb[17].mxu0  ;;  %v876_v53 = vpop.f32.mrb[17].mxu1 }
 0x117   :  { %v829_v54 = vadd.f32 %v828_v52, %v827_v49  ;;  %v877_v55 = vadd.f32 %v876_v53, %v875_v50  ;;  %v830_v56 = vpop.f32.mrb[18].mxu0  ;;  %v878_v57 = vpop.f32.mrb[18].mxu1 }
 0x118   :  { %v831_v58 = vpop.f32.mrb[19].mxu0  ;;  %v879_v59 = vpop.f32.mrb[19].mxu1 }
 0x119   :  { %v678_v60 = vadd.f32 %v829_v54, %v1146_v51  ;;  %v694_v61 = vadd.f32 %v877_v55, %v1146_v51  ;;  %v832_v62 = vadd.f32 %v831_v58, %v830_v56  ;;  %v880_v63 = vadd.f32 %v879_v59, %v878_v57 }
 0x11b   :  { %710 = vst [vmem:[%s1279_s3 + $0x40] sm:$0xff] %v678_v60  ;;  %726 = vst [vmem:[%s1279_s3 + $0xc0] sm:$0xff] %v694_v61  ;;  %v679_v0 = vadd.f32 %v832_v62, %v1146_v51  ;;  %v695_v1 = vadd.f32 %v880_v63, %v1146_v51 }
 0x11d   :  { %711 = vst [vmem:[%s1279_s3 + $0x48] sm:$0xff] %v679_v0  ;;  %727 = vst [vmem:[%s1279_s3 + $0xc8] sm:$0xff] %v695_v1  ;;  %v833_v2 = vpop.f32.mrb[20].mxu0  ;;  %v881_v3 = vpop.f32.mrb[20].mxu1 }
 0x11e   :  { %v834_v4 = vpop.f32.mrb[21].mxu0  ;;  %v882_v5 = vpop.f32.mrb[21].mxu1 }
 0x11f   :  { %v835_v6 = vadd.f32 %v834_v4, %v833_v2  ;;  %v883_v7 = vadd.f32 %v882_v5, %v881_v3  ;;  %v836_v8 = vpop.f32.mrb[22].mxu0  ;;  %v884_v9 = vpop.f32.mrb[22].mxu1 }
 0x120   :  { %v837_v10 = vpop.f32.mrb[23].mxu0  ;;  %v885_v11 = vpop.f32.mrb[23].mxu1 }
 0x121   :  { %v680_v12 = vadd.f32 %v835_v6, %v1146_v51  ;;  %v696_v13 = vadd.f32 %v883_v7, %v1146_v51  ;;  %v838_v14 = vadd.f32 %v837_v10, %v836_v8  ;;  %v886_v15 = vadd.f32 %v885_v11, %v884_v9 }
 0x123   :  { %712 = vst [vmem:[%s1279_s3 + $0x50] sm:$0xff] %v680_v12  ;;  %728 = vst [vmem:[%s1279_s3 + $0xd0] sm:$0xff] %v696_v13  ;;  %v681_v16 = vadd.f32 %v838_v14, %v1146_v51  ;;  %v697_v17 = vadd.f32 %v886_v15, %v1146_v51 }
 0x125   :  { %713 = vst [vmem:[%s1279_s3 + $0x58] sm:$0xff] %v681_v16  ;;  %729 = vst [vmem:[%s1279_s3 + $0xd8] sm:$0xff] %v697_v17  ;;  %v839_v18 = vpop.f32.mrb[24].mxu0  ;;  %v887_v19 = vpop.f32.mrb[24].mxu1 }
 0x126   :  { %v840_v20 = vpop.f32.mrb[25].mxu0  ;;  %v888_v21 = vpop.f32.mrb[25].mxu1 }
 0x127   :  { %v841_v22 = vadd.f32 %v840_v20, %v839_v18  ;;  %v889_v23 = vadd.f32 %v888_v21, %v887_v19  ;;  %v842_v24 = vpop.f32.mrb[26].mxu0  ;;  %v890_v25 = vpop.f32.mrb[26].mxu1 }
 0x128   :  { %v843_v26 = vpop.f32.mrb[27].mxu0  ;;  %v891_v27 = vpop.f32.mrb[27].mxu1 }
 0x129   :  { %v682_v28 = vadd.f32 %v841_v22, %v1146_v51  ;;  %v698_v29 = vadd.f32 %v889_v23, %v1146_v51  ;;  %v844_v30 = vadd.f32 %v843_v26, %v842_v24  ;;  %v892_v31 = vadd.f32 %v891_v27, %v890_v25 }
 0x12b   :  { %714 = vst [vmem:[%s1279_s3 + $0x60] sm:$0xff] %v682_v28  ;;  %730 = vst [vmem:[%s1279_s3 + $0xe0] sm:$0xff] %v698_v29  ;;  %v683_v32 = vadd.f32 %v844_v30, %v1146_v51  ;;  %v699_v33 = vadd.f32 %v892_v31, %v1146_v51 }
 0x12d   :  { %715 = vst [vmem:[%s1279_s3 + $0x68] sm:$0xff] %v683_v32  ;;  %731 = vst [vmem:[%s1279_s3 + $0xe8] sm:$0xff] %v699_v33  ;;  %v845_v34 = vpop.f32.mrb[28].mxu0  ;;  %v893_v35 = vpop.f32.mrb[28].mxu1 }
 0x12e   :  { %v846_v36 = vpop.f32.mrb[29].mxu0  ;;  %v894_v37 = vpop.f32.mrb[29].mxu1 }
 0x12f   :  { %v847_v38 = vadd.f32 %v846_v36, %v845_v34  ;;  %v895_v39 = vadd.f32 %v894_v37, %v893_v35  ;;  %v848_v40 = vpop.f32.mrb[30].mxu0  ;;  %v896_v41 = vpop.f32.mrb[30].mxu1 }
 0x130   :  { %v849_v42 = vpop.f32.mrb[31].mxu0  ;;  %v897_v43 = vpop.f32.mrb[31].mxu1 }
 0x131   :  { %v684_v44 = vadd.f32 %v847_v38, %v1146_v51  ;;  %v700_v45 = vadd.f32 %v895_v39, %v1146_v51  ;;  %v850_v46 = vadd.f32 %v849_v42, %v848_v40  ;;  %v898_v47 = vadd.f32 %v897_v43, %v896_v41 }
 0x133   :  { %716 = vst [vmem:[%s1279_s3 + $0x70] sm:$0xff] %v684_v44  ;;  %732 = vst [vmem:[%s1279_s3 + $0xf0] sm:$0xff] %v700_v45  ;;  %v685_v48 = vadd.f32 %v850_v46, %v1146_v51  ;;  %v701_v49 = vadd.f32 %v898_v47, %v1146_v51 }
 0x135   :  { %717 = vst [vmem:[%s1279_s3 + $0x78] sm:$0xff] %v685_v48  ;;  %733 = vst [vmem:[%s1279_s3 + $0xf8] sm:$0xff] %v701_v49 }

// kernel: jknet_forward.4
= control target key start
LH: loop header
LB: loop body
LE: loop exit
PB: predicated region body
PF: predicated region fallthrough
CT: control target
= control target key end

     0   :  { %v2498_v1 = vmov 0   ;;  %s3008_s1 = inlined_call_operand.vmem [shape: bf16[256,128], index: 1, kind: input, shape index: {}]   ;;  %s3009_s0 = inlined_call_operand.vmem [shape: bf16[256,256], index: 0, kind: input, shape index: {}]   ;;  %s3010_s2 = inlined_call_operand.vmem [shape: f32[256,1], index: 2, kind: input, shape index: {}]   ;;  %s3011_s6 = inlined_call_operand.vmem [shape: f32[128,128], index: 6, kind: input, shape index: {}]   ;;  %s3012_s5 = inlined_call_operand.vmem [shape: f32[128,128], index: 5, kind: input, shape index: {}]   ;;  %s3013_s3 = inlined_call_operand.vmem [shape: f32[1,128], index: 3, kind: input, shape index: {}]   ;;  %s3014_s4 = inlined_call_operand.vmem [shape: bf16[256,128], index: 4, kind: input, shape index: {}]   ;;  %s3015_s7 = inlined_call_operand.vmem [shape: bf16[256,128], index: 7, kind: output, shape index: {}]  }
   0x1   :  { %v2434_v0 = vld [vmem:[%s3008_s1 + $0x40] sm:$0xff]   ;;  %2432 = vset.pattern.permute.xlu0 %v2498_v1  ;;  %2433 = vset.pattern.permute.xlu1 %v2498_v1  ;;  %v2436_v3 = vld [vmem:[%s3008_s1 + $0x48] sm:$0xff]   ;;  %v2438_v5 = vld [vmem:[%s3008_s1 + $0x50] sm:$0xff]  }
   0x2   :  { %v2435_v2 = vld [vmem:[%s3008_s1] sm:$0xff]   ;;  %1967 = vmatprep.subr.bf16.mxu0 %v2434_v0  ;;  %v2437_v4 = vld [vmem:[%s3008_s1 + $0x8] sm:$0xff]   ;;  %v2439_v6 = vld [vmem:[%s3008_s1 + $0x10] sm:$0xff]  }
   0x3   :  { %1968 = vmatpush3.bf16.msra.mxu0 %v2435_v2  ;;  %v2440_v7 = vld [vmem:[%s3008_s1 + $0x58] sm:$0xff]   ;;  %v2442_v9 = vld [vmem:[%s3008_s1 + $0x60] sm:$0xff]   ;;  %v2444_v11 = vld [vmem:[%s3008_s1 + $0x68] sm:$0xff]  }
   0x4   :  { %1969 = vmatprep.subr.bf16.mxu0 %v2436_v3  ;;  %v2441_v8 = vld [vmem:[%s3008_s1 + $0x18] sm:$0xff]   ;;  %v2443_v10 = vld [vmem:[%s3008_s1 + $0x20] sm:$0xff]   ;;  %v2445_v13 = vld [vmem:[%s3008_s1 + $0x28] sm:$0xff]  }
   0x5   :  { %v2452_v12 = vld [vmem:[%s3009_s0 + $0x4] ss:$8 sps:$4 sm:$0xff]   ;;  %v2446_v14 = vld [vmem:[%s3008_s1 + $0x70] sm:$0xff]   ;;  %v2448_v16 = vld [vmem:[%s3008_s1 + $0x78] sm:$0xff]  }
   0x6   :  { %447 = vmatprep.mubr.bf16.mxu0 %v2452_v12  ;;  %v2447_v15 = vld [vmem:[%s3008_s1 + $0x30] sm:$0xff]   ;;  %v2449_v17 = vld [vmem:[%s3008_s1 + $0x38] sm:$0xff]   ;;  %v2450_v18 = vld [vmem:[%s3009_s0] ss:$8 sps:$4 sm:$0xff]  }
   0x7   :  { %1970 = vmatpush3.bf16.msra.mxu0 %v2437_v4  ;;  %v675_v19 = vld [vmem:[%s3010_s2] sm:$0xff]  ;;  %v2453_v20 = vld [vmem:[%s3009_s0 + $0x14] ss:$8 sps:$4 sm:$0xff]   ;;  %v676_v22 = vld [vmem:[%s3010_s2 + $0x8] sm:$0xff] }
   0x8   :  { %1971 = vmatprep.subr.bf16.mxu0 %v2438_v5  ;;  %709 = vperm.xlu0 %2432, %v675_v19   ;;  %v677_v21 = vld [vmem:[%s3010_s2 + $0x10] sm:$0xff]  ;;  %v678_v23 = vld [vmem:[%s3010_s2 + $0x18] sm:$0xff]  ;;  %v679_v24 = vld [vmem:[%s3010_s2 + $0x20] sm:$0xff] }
   0x9   :  { %719 = vperm.xlu1 %2433, %v677_v21   ;;  %v2455_v25 = vld [vmem:[%s3009_s0 + $0x10] ss:$8 sps:$4 sm:$0xff]   ;;  %v680_v26 = vld [vmem:[%s3010_s2 + $0x28] sm:$0xff]  ;;  %v683_v30 = vld [vmem:[%s3010_s2 + $0x40] sm:$0xff] }
   0xa   :  { %v2456_v27 = vld [vmem:[%s3009_s0 + $0x24] ss:$8 sps:$4 sm:$0xff]   ;;  %v681_v28 = vld [vmem:[%s3010_s2 + $0x30] sm:$0xff]  ;;  %v682_v29 = vld [vmem:[%s3010_s2 + $0x38] sm:$0xff] }
   0xb   :  { %1972 = vmatpush3.bf16.msra.mxu0 %v2439_v6  ;;  %v2458_v31 = vld [vmem:[%s3009_s0 + $0x20] ss:$8 sps:$4 sm:$0xff]   ;;  %v2459_v33 = vld [vmem:[%s3009_s0 + $0x34] ss:$8 sps:$4 sm:$0xff]   ;;  %v2461_v45 = vld [vmem:[%s3009_s0 + $0x30] ss:$8 sps:$4 sm:$0xff]  }
   0xc   :  { %1973 = vmatprep.subr.bf16.mxu0 %v2440_v7  ;;  %714 = vperm.xlu0 %2432, %v676_v22   ;;  %v684_v32 = vld [vmem:[%s3010_s2 + $0x48] sm:$0xff]  ;;  %v685_v34 = vld [vmem:[%s3010_s2 + $0x50] sm:$0xff]  ;;  %v1050_v35 = vld [vmem:[%s3011_s6] sm:$0xff] }
   0xd   :  { %724 = vperm.xlu1 %2433, %v678_v23   ;;  %v1051_v36 = vld [vmem:[%s3011_s6 + $0x8] sm:$0xff]  ;;  %v1052_v37 = vld [vmem:[%s3011_s6 + $0x10] sm:$0xff]  ;;  %v1053_v39 = vld [vmem:[%s3011_s6 + $0x18] sm:$0xff] }
   0xe   :  { %v2335_v38 = vpack.c.bf16 %v1051_v36, %v1050_v35  ;;  %v686_v40 = vld [vmem:[%s3010_s2 + $0x58] sm:$0xff]  ;;  %v2339_v41 = vpack.c.bf16 %v1053_v39, %v1052_v37  ;;  %v1054_v42 = vld [vmem:[%s3011_s6 + $0x20] sm:$0xff]  ;;  %v1055_v43 = vld [vmem:[%s3011_s6 + $0x28] sm:$0xff] }
   0xf   :  { %1974 = vmatpush3.bf16.msra.mxu0 %v2441_v8  ;;  %v687_v44 = vld [vmem:[%s3010_s2 + $0x60] sm:$0xff]  ;;  %v688_v46 = vld [vmem:[%s3010_s2 + $0x68] sm:$0xff]  ;;  %v2343_v47 = vpack.c.bf16 %v1055_v43, %v1054_v42  ;;  %v1056_v49 = vld [vmem:[%s3011_s6 + $0x30] sm:$0xff] }
  0x10   :  { %1975 = vmatprep.subr.bf16.mxu0 %v2442_v9  ;;  %729 = vperm.xlu0 %2432, %v679_v24   ;;  %v2462_v48 = vld [vmem:[%s3009_s0 + $0x44] ss:$8 sps:$4 sm:$0xff]   ;;  %v1057_v50 = vld [vmem:[%s3011_s6 + $0x38] sm:$0xff]  ;;  %v689_v51 = vld [vmem:[%s3010_s2 + $0x70] sm:$0xff] }
  0x11   :  { %734 = vperm.xlu1 %2433, %v680_v26   ;;  %2336 = vmatprep.subr.bf16.mxu1 %v2335_v38  ;;  %v690_v52 = vld [vmem:[%s3010_s2 + $0x78] sm:$0xff]  ;;  %v2347_v53 = vpack.c.bf16 %v1057_v50, %v1056_v49  ;;  %v1058_v54 = vld [vmem:[%s3011_s6 + $0x40] sm:$0xff]  ;;  %v1059_v55 = vld [vmem:[%s3011_s6 + $0x48] sm:$0xff] }
  0x12   :  { %2338 = vmatpush3.bf16.msra.mxu1 %v2335_v38  ;;  %v691_v56 = vld [vmem:[%s3010_s2 + $0x80] sm:$0xff]  ;;  %v692_v58 = vld [vmem:[%s3010_s2 + $0x88] sm:$0xff]  ;;  %v2351_v59 = vpack.c.bf16 %v1059_v55, %v1058_v54  ;;  %v2465_v60 = vld [vmem:[%s3009_s0 + $0x54] ss:$8 sps:$4 sm:$0xff]  }
  0x13   :  { %1976 = vmatpush3.bf16.msra.mxu0 %v2443_v10  ;;  %2340 = vmatprep.subr.bf16.mxu1 %v2339_v41  ;;  %v2464_v57 = vld [vmem:[%s3009_s0 + $0x40] ss:$8 sps:$4 sm:$0xff]   ;;  %v693_v61 = vld [vmem:[%s3010_s2 + $0x90] sm:$0xff]  ;;  %v694_v62 = vld [vmem:[%s3010_s2 + $0x98] sm:$0xff] }
  0x14   :  { %1977 = vmatprep.subr.bf16.mxu0 %v2444_v11  ;;  %739 = vperm.xlu0 %2432, %v681_v28   ;;  %v695_v63 = vld [vmem:[%s3010_s2 + $0xa0] sm:$0xff]  ;;  %v2467_v0 = vld [vmem:[%s3009_s0 + $0x50] ss:$8 sps:$4 sm:$0xff]   ;;  %v696_v1 = vld [vmem:[%s3010_s2 + $0xa8] sm:$0xff] }
  0x15   :  { %744 = vperm.xlu1 %2433, %v682_v29   ;;  %v2468_v2 = vld [vmem:[%s3009_s0 + $0x64] ss:$8 sps:$4 sm:$0xff]   ;;  %v697_v3 = vld [vmem:[%s3010_s2 + $0xb0] sm:$0xff]  ;;  %v698_v4 = vld [vmem:[%s3010_s2 + $0xb8] sm:$0xff] }
  0x16   :  { %2342 = vmatpush3.bf16.msra.mxu1 %v2339_v41  ;;  %v699_v5 = vld [vmem:[%s3010_s2 + $0xc0] sm:$0xff]  ;;  %v700_v7 = vld [vmem:[%s3010_s2 + $0xc8] sm:$0xff]  ;;  %v2471_v8 = vld [vmem:[%s3009_s0 + $0x74] ss:$8 sps:$4 sm:$0xff]  }
  0x17   :  { %1978 = vmatpush3.bf16.msra.mxu0 %v2445_v13  ;;  %2344 = vmatprep.subr.bf16.mxu1 %v2343_v47  ;;  %v2470_v6 = vld [vmem:[%s3009_s0 + $0x60] ss:$8 sps:$4 sm:$0xff]   ;;  %v701_v9 = vld [vmem:[%s3010_s2 + $0xd0] sm:$0xff]  ;;  %v702_v10 = vld [vmem:[%s3010_s2 + $0xd8] sm:$0xff] }
  0x18   :  { %1979 = vmatprep.subr.bf16.mxu0 %v2446_v14  ;;  %749 = vperm.xlu0 %2432, %v683_v30   ;;  %v703_v11 = vld [vmem:[%s3010_s2 + $0xe0] sm:$0xff]  ;;  %v2473_v12 = vld [vmem:[%s3009_s0 + $0x70] ss:$8 sps:$4 sm:$0xff]   ;;  %v704_v13 = vld [vmem:[%s3010_s2 + $0xe8] sm:$0xff] }
  0x19   :  { %754 = vperm.xlu1 %2433, %v684_v32   ;;  %v2474_v14 = vld [vmem:[%s3009_s0 + $0x84] ss:$8 sps:$4 sm:$0xff]   ;;  %v2479_v19 = vld [vmem:[%s3009_s0 + $0x90] ss:$8 sps:$4 sm:$0xff]   ;;  %v2482_v21 = vld [vmem:[%s3009_s0 + $0xa0] ss:$8 sps:$4 sm:$0xff]  }
  0x1a   :  { %2346 = vmatpush3.bf16.msra.mxu1 %v2343_v47  ;;  %v2483_v22 = vld [vmem:[%s3009_s0 + $0xb4] ss:$8 sps:$4 sm:$0xff]   ;;  %v2485_v26 = vld [vmem:[%s3009_s0 + $0xb0] ss:$8 sps:$4 sm:$0xff]   ;;  %v1063_v28 = vld [vmem:[%s3011_s6 + $0x68] sm:$0xff] }
  0x1b   :  { %1980 = vmatpush3.bf16.msra.mxu0 %v2447_v15  ;;  %2348 = vmatprep.subr.bf16.mxu1 %v2347_v53  ;;  %v705_v15 = vld [vmem:[%s3010_s2 + $0xf0] sm:$0xff]  ;;  %v1061_v24 = vld [vmem:[%s3011_s6 + $0x58] sm:$0xff]  ;;  %v2486_v29 = vld [vmem:[%s3009_s0 + $0xc4] ss:$8 sps:$4 sm:$0xff]  }
  0x1c   :  { %1981 = vmatprep.subr.bf16.mxu0 %v2448_v16  ;;  %759 = vperm.xlu0 %2432, %v685_v34   ;;  %v706_v16 = vld [vmem:[%s3010_s2 + $0xf8] sm:$0xff]  ;;  %v1060_v23 = vld [vmem:[%s3011_s6 + $0x50] sm:$0xff]  ;;  %v2488_v34 = vld [vmem:[%s3009_s0 + $0xc0] ss:$8 sps:$4 sm:$0xff]  }
  0x1d   :  { %764 = vperm.xlu1 %2433, %v686_v40   ;;  %v1065_v32 = vld [vmem:[%s3011_s6 + $0x78] sm:$0xff]  ;;  %v2492_v37 = vld [vmem:[%s3009_s0 + $0xe4] ss:$8 sps:$4 sm:$0xff]   ;;  %v2494_v38 = vld [vmem:[%s3009_s0 + $0xe0] ss:$8 sps:$4 sm:$0xff]  }
  0x1e   :  { %2350 = vmatpush3.bf16.msra.mxu1 %v2347_v53  ;;  %v2489_v35 = vld [vmem:[%s3009_s0 + $0xd4] ss:$8 sps:$4 sm:$0xff]   ;;  %v2491_v36 = vld [vmem:[%s3009_s0 + $0xd0] ss:$8 sps:$4 sm:$0xff]   ;;  %v1034_v41 = vld [vmem:[%s3012_s5] sm:$0xff] }
  0x1f   :  { %1982 = vmatpush3.bf16.msra.mxu0 %v2449_v17  ;;  %2352 = vmatprep.subr.bf16.mxu1 %v2351_v59  ;;  %v2476_v17 = vld [vmem:[%s3009_s0 + $0x80] ss:$8 sps:$4 sm:$0xff]   ;;  %v2495_v39 = vld [vmem:[%s3009_s0 + $0xf4] ss:$8 sps:$4 sm:$0xff]   ;;  %v2497_v40 = vld [vmem:[%s3009_s0 + $0xf0] ss:$8 sps:$4 sm:$0xff]  }
  0x20   :  { %769 = vperm.xlu0 %2432, %v687_v44   ;;  %v1035_v42 = vld [vmem:[%s3012_s5 + $0x8] sm:$0xff]  ;;  %v2836_v50 = vld [vmem:[%s3013_s3] ss:$0 sm:$0xff] }
  0x21   :  { %774 = vperm.xlu1 %2433, %v688_v46   ;;  %v2367_v43 = vpack.c.bf16 %v1035_v42, %v1034_v41 }
  0x22   :  { %448 = vmatmul.mubr.bf16.vlgmr.msra.gmra.mrb[0].mxu0 %v2450_v18  ;;  %2354 = vmatpush3.bf16.msra.mxu1 %v2351_v59  ;;  %v2477_v18 = vld [vmem:[%s3009_s0 + $0x94] ss:$8 sps:$4 sm:$0xff]  }
  0x23   :  { %455 = vmatprep.mubr.bf16.mxu0 %v2453_v20  ;;  %v2480_v20 = vld [vmem:[%s3009_s0 + $0xa4] ss:$8 sps:$4 sm:$0xff]  }
  0x24   :  { %779 = vperm.xlu0 %2432, %v689_v51  }
  0x25   :  { %784 = vperm.xlu1 %2433, %v690_v52  }
  0x28   :  { %789 = vperm.xlu0 %2432, %v691_v56  }
  0x29   :  { %794 = vperm.xlu1 %2433, %v692_v58   ;;  %v1037_v58 = vld [vmem:[%s3012_s5 + $0x18] sm:$0xff] }
  0x2a   :  { %456 = vmatmul.mubr.bf16.gmra.mrb[4].mxu0 %v2455_v25  ;;  %v2355_v25 = vpack.c.bf16 %v1061_v24, %v1060_v23  ;;  %v1042_v24 = vld [vmem:[%s3012_s5 + $0x40] sm:$0xff] }
  0x2b   :  { %463 = vmatprep.mubr.bf16.mxu0 %v2456_v27  ;;  %v1062_v27 = vld [vmem:[%s3011_s6 + $0x60] sm:$0xff] }
  0x2c   :  { %799 = vperm.xlu0 %2432, %v693_v61   ;;  %2356 = vmatprep.subr.bf16.mxu1 %v2355_v25  ;;  %v2359_v30 = vpack.c.bf16 %v1063_v28, %v1062_v27 }
  0x2d   :  { %804 = vperm.xlu1 %2433, %v694_v62   ;;  %2358 = vmatpush3.bf16.msra.mxu1 %v2355_v25  ;;  %v1043_v25 = vld [vmem:[%s3012_s5 + $0x48] sm:$0xff] }
  0x2e   :  { %2360 = vmatprep.subr.bf16.mxu1 %v2359_v30 }
  0x30   :  { %809 = vperm.xlu0 %2432, %v695_v63  }
  0x31   :  { %814 = vperm.xlu1 %2433, %v696_v1   ;;  %2362 = vmatpush3.bf16.msra.mxu1 %v2359_v30 }
  0x32   :  { %464 = vmatmul.mubr.bf16.gmra.mrb[8].mxu0 %v2458_v31  ;;  %v1064_v31 = vld [vmem:[%s3011_s6 + $0x70] sm:$0xff] }
  0x33   :  { %471 = vmatprep.mubr.bf16.mxu0 %v2459_v33  ;;  %v2363_v33 = vpack.c.bf16 %v1065_v32, %v1064_v31  ;;  %v2383_v31 = vpack.c.bf16 %v1043_v25, %v1042_v24  ;;  %v1044_v32 = vld [vmem:[%s3012_s5 + $0x50] sm:$0xff] }
  0x34   :  { %819 = vperm.xlu0 %2432, %v697_v3  }
  0x35   :  { %824 = vperm.xlu1 %2433, %v698_v4   ;;  %2364 = vmatprep.subr.bf16.mxu1 %v2363_v33  ;;  %v1038_v4 = vld [vmem:[%s3012_s5 + $0x20] sm:$0xff] }
  0x36   :  { %2366 = vmatpush3.bf16.msra.mxu1 %v2363_v33  ;;  %v1045_v33 = vld [vmem:[%s3012_s5 + $0x58] sm:$0xff] }
  0x37   :  { %2368 = vmatprep.subr.bf16.mxu1 %v2367_v43  ;;  %v2387_v41 = vpack.c.bf16 %v1045_v33, %v1044_v32 }
  0x38   :  { %829 = vperm.xlu0 %2432, %v699_v5   ;;  %v1039_v5 = vld [vmem:[%s3012_s5 + $0x28] sm:$0xff] }
  0x39   :  { %834 = vperm.xlu1 %2433, %v700_v7  }
  0x3a   :  { %472 = vmatmul.mubr.bf16.gmra.mrb[12].mxu0 %v2461_v45 }
  0x3b   :  { %479 = vmatprep.mubr.bf16.mxu0 %v2462_v48 }
  0x3c   :  { %839 = vperm.xlu0 %2432, %v701_v9  }
  0x3d   :  { %844 = vperm.xlu1 %2433, %v702_v10  }
  0x40   :  { %849 = vperm.xlu0 %2432, %v703_v11   ;;  %v2375_v11 = vpack.c.bf16 %v1039_v5, %v1038_v4 }
  0x41   :  { %854 = vperm.xlu1 %2433, %v704_v13   ;;  %v1041_v13 = vld [vmem:[%s3012_s5 + $0x38] sm:$0xff] }
  0x42   :  { %480 = vmatmul.mubr.bf16.gmra.mrb[16].mxu0 %v2464_v57  ;;  %v1036_v57 = vld [vmem:[%s3012_s5 + $0x10] sm:$0xff] }
  0x43   :  { %487 = vmatprep.mubr.bf16.mxu0 %v2465_v60 }
  0x44   :  { %859 = vperm.xlu0 %2432, %v705_v15  }
  0x45   :  { %864 = vperm.xlu1 %2433, %v706_v16  }
  0x4a   :  { %488 = vmatmul.mubr.bf16.gmra.mrb[20].mxu0 %v2467_v0 }
  0x4b   :  { %495 = vmatprep.mubr.bf16.mxu0 %v2468_v2  ;;  %v2371_v2 = vpack.c.bf16 %v1037_v58, %v1036_v57 }
  0x52   :  { %496 = vmatmul.mubr.bf16.gmra.mrb[24].mxu0 %v2470_v6 }
  0x53   :  { %503 = vmatprep.mubr.bf16.mxu0 %v2471_v8 }
  0x5a   :  { %504 = vmatmul.mubr.bf16.gmra.mrb[28].mxu0 %v2473_v12  ;;  %v1040_v12 = vld [vmem:[%s3012_s5 + $0x30] sm:$0xff] }
  0x5b   :  { %511 = vmatprep.mubr.bf16.mxu0 %v2474_v14 }
  0x62   :  { %512 = vmatmul.mubr.bf16.gmra.mrb[32].mxu0 %v2476_v17 }
  0x63   :  { %519 = vmatprep.mubr.bf16.mxu0 %v2477_v18 }
  0x6a   :  { %520 = vmatmul.mubr.bf16.gmra.mrb[36].mxu0 %v2479_v19 }
  0x6b   :  { %527 = vmatprep.mubr.bf16.mxu0 %v2480_v20 }
  0x72   :  { %528 = vmatmul.mubr.bf16.gmra.mrb[40].mxu0 %v2482_v21  ;;  %v2379_v21 = vpack.c.bf16 %v1041_v13, %v1040_v12 }
  0x73   :  { %535 = vmatprep.mubr.bf16.mxu0 %v2483_v22 }
  0x7a   :  { %536 = vmatmul.mubr.bf16.gmra.mrb[44].mxu0 %v2485_v26 }
  0x7b   :  { %543 = vmatprep.mubr.bf16.mxu0 %v2486_v29 }
  0x82   :  { %544 = vmatmul.mubr.bf16.gmra.mrb[48].mxu0 %v2488_v34 }
  0x83   :  { %551 = vmatprep.mubr.bf16.mxu0 %v2489_v35 }
  0x87   :  { %v710_v44 = vpop.permute.xlu0 %709 }
  0x88   :  { %v720_v56 = vpop.permute.xlu1 %719 }
  0x8a   :  { %552 = vmatmul.mubr.bf16.gmra.mrb[52].mxu0 %v2491_v36 }
  0x8b   :  { %559 = vmatprep.mubr.bf16.mxu0 %v2492_v37  ;;  %v715_v51 = vpop.permute.xlu0 %714 }
  0x8c   :  { %v725_v8 = vpop.permute.xlu1 %724 }
  0x8f   :  { %v730_v22 = vpop.permute.xlu0 %729 }
  0x90   :  { %v735_v28 = vpop.permute.xlu1 %734 }
  0x92   :  { %560 = vmatmul.mubr.bf16.gmra.mrb[56].mxu0 %v2494_v38 }
  0x93   :  { %567 = vmatprep.mubr.bf16.mxu0 %v2495_v39  ;;  %v740_v42 = vpop.permute.xlu0 %739 }
  0x9a   :  { %568 = vmatmul.mubr.bf16.gmra.mrb[60].mxu0 %v2497_v40 }
  0xf5   :  { %v1983_v45 = vpop.f32.mrb[0].mxu0 }
  0xf6   :  { %v1984_v46 = vpop.f32.mrb[1].mxu0 }
  0xf7   :  { %v1985_v47 = vadd.f32 %v1984_v46, %v1983_v45  ;;  %v1986_v48 = vpop.f32.mrb[2].mxu0  ;;  %v1047_v45 = vld [vmem:[%s3012_s5 + $0x68] sm:$0xff] }
  0xf8   :  { %v1987_v49 = vpop.f32.mrb[3].mxu0 }
  0xf9   :  { %v1988_v52 = vadd.f32 %v1987_v49, %v1986_v48  ;;  %v867_v53 = vmul.f32 %v1985_v47, %v710_v44  ;;  %v1046_v44 = vld [vmem:[%s3012_s5 + $0x60] sm:$0xff]  ;;  %v745_v48 = vpop.permute.xlu1 %744 }
  0xfb   :  { %v868_v54 = vmul.f32 %v1988_v52, %v715_v51  ;;  %v906_v55 = vadd.f32 %v2836_v50, %v867_v53  ;;  %v2391_v52 = vpack.c.bf16 %v1047_v45, %v1046_v44  ;;  %v1048_v53 = vld [vmem:[%s3012_s5 + $0x70] sm:$0xff] }
  0xfd   :  { %v907_v59 = vadd.f32 %v2836_v50, %v868_v54  ;;  %v1989_v60 = vpop.f32.mrb[4].mxu0  ;;  %v938_v61 = vmax.f32 %v906_v55, 0.0  ;;  %v1049_v54 = vld [vmem:[%s3012_s5 + $0x78] sm:$0xff] }
  0xfe   :  { %v1990_v62 = vpop.f32.mrb[5].mxu0 }
  0xff   :  { %v939_v63 = vmax.f32 %v907_v59, 0.0  ;;  %v1991_v0 = vadd.f32 %v1990_v62, %v1989_v60  ;;  %v1992_v1 = vpop.f32.mrb[6].mxu0  ;;  %2207 = vmatprep.mubr.f32.mxu1 %v938_v61  ;;  %v2395_v62 = vpack.c.bf16 %v1049_v54, %v1048_v53 }
 0x100   :  { %v1993_v3 = vpop.f32.mrb[7].mxu0 }
 0x101   :  { %v869_v6 = vmul.f32 %v1991_v0, %v720_v56  ;;  %v1994_v7 = vadd.f32 %v1993_v3, %v1992_v1  ;;  %2208 = vmatmul.mubr.f32.vlgmr.msra.gmra.mrb[0].mxu1 %v939_v63  ;;  %v750_v63 = vpop.permute.xlu0 %749  ;;  %v755_v3 = vpop.permute.xlu1 %754 }
 0x102   :  { %2370 = vmatpush3.bf16.msra.mxu1 %v2367_v43 }
 0x103   :  { %v870_v9 = vmul.f32 %v1994_v7, %v725_v8  ;;  %v908_v10 = vadd.f32 %v2836_v50, %v869_v6  ;;  %2372 = vmatprep.subr.bf16.mxu1 %v2371_v2 }
 0x105   :  { %v1995_v14 = vpop.f32.mrb[8].mxu0  ;;  %v940_v15 = vmax.f32 %v908_v10, 0.0  ;;  %v909_v16 = vadd.f32 %v2836_v50, %v870_v9  ;;  %v760_v13 = vpop.permute.xlu0 %759 }
 0x106   :  { %v1996_v17 = vpop.f32.mrb[9].mxu0  ;;  %2374 = vmatpush3.bf16.msra.mxu1 %v2371_v2 }
 0x107   :  { %v1997_v18 = vadd.f32 %v1996_v17, %v1995_v14  ;;  %v1998_v19 = vpop.f32.mrb[10].mxu0  ;;  %2210 = vmatprep.mubr.f32.mxu1 %v940_v15  ;;  %v941_v20 = vmax.f32 %v909_v16, 0.0  ;;  %2376 = vmatprep.subr.bf16.mxu1 %v2375_v11  ;;  %v765_v17 = vpop.permute.xlu1 %764 }
 0x108   :  { %v1999_v23 = vpop.f32.mrb[11].mxu0 }
 0x109   :  { %v871_v26 = vmul.f32 %v1997_v18, %v730_v22  ;;  %v2000_v27 = vadd.f32 %v1999_v23, %v1998_v19  ;;  %2211 = vmatmul.mubr.f32.gmra.mrb[2].mxu1 %v941_v20 }
 0x10a   :  { %2378 = vmatpush3.bf16.msra.mxu1 %v2375_v11 }
 0x10b   :  { %v872_v29 = vmul.f32 %v2000_v27, %v735_v28  ;;  %v910_v30 = vadd.f32 %v2836_v50, %v871_v26  ;;  %2380 = vmatprep.subr.bf16.mxu1 %v2379_v21  ;;  %v770_v27 = vpop.permute.xlu0 %769 }
 0x10d   :  { %v2001_v34 = vpop.f32.mrb[12].mxu0  ;;  %v942_v35 = vmax.f32 %v910_v30, 0.0  ;;  %v911_v36 = vadd.f32 %v2836_v50, %v872_v29 }
 0x10e   :  { %v2002_v37 = vpop.f32.mrb[13].mxu0  ;;  %2382 = vmatpush3.bf16.msra.mxu1 %v2379_v21 }
 0x10f   :  { %v2003_v38 = vadd.f32 %v2002_v37, %v2001_v34  ;;  %v2004_v39 = vpop.f32.mrb[14].mxu0  ;;  %2213 = vmatprep.mubr.f32.mxu1 %v942_v35  ;;  %v943_v40 = vmax.f32 %v911_v36, 0.0  ;;  %2384 = vmatprep.subr.bf16.mxu1 %v2383_v31 }
 0x110   :  { %v2005_v43 = vpop.f32.mrb[15].mxu0 }
 0x111   :  { %v873_v46 = vmul.f32 %v2003_v38, %v740_v42  ;;  %v2006_v47 = vadd.f32 %v2005_v43, %v2004_v39  ;;  %2214 = vmatmul.mubr.f32.gmra.mrb[4].mxu1 %v943_v40 }
 0x112   :  { %2386 = vmatpush3.bf16.msra.mxu1 %v2383_v31  ;;  %v775_v31 = vpop.permute.xlu1 %774 }
 0x113   :  { %v874_v49 = vmul.f32 %v2006_v47, %v745_v48  ;;  %v912_v51 = vadd.f32 %v2836_v50, %v873_v46  ;;  %2388 = vmatprep.subr.bf16.mxu1 %v2387_v41 }
 0x115   :  { %v2007_v55 = vpop.f32.mrb[16].mxu0  ;;  %v944_v56 = vmax.f32 %v912_v51, 0.0  ;;  %v913_v57 = vadd.f32 %v2836_v50, %v874_v49 }
 0x116   :  { %v2008_v58 = vpop.f32.mrb[17].mxu0  ;;  %2390 = vmatpush3.bf16.msra.mxu1 %v2387_v41  ;;  %v780_v41 = vpop.permute.xlu0 %779 }
 0x117   :  { %v2009_v59 = vadd.f32 %v2008_v58, %v2007_v55  ;;  %v2010_v60 = vpop.f32.mrb[18].mxu0  ;;  %2216 = vmatprep.mubr.f32.mxu1 %v944_v56  ;;  %v945_v61 = vmax.f32 %v913_v57, 0.0  ;;  %2392 = vmatprep.subr.bf16.mxu1 %v2391_v52  ;;  %v785_v45 = vpop.permute.xlu1 %784 }
 0x118   :  { %v2011_v0 = vpop.f32.mrb[19].mxu0 }
 0x119   :  { %v875_v1 = vmul.f32 %v2009_v59, %v750_v63  ;;  %v2012_v2 = vadd.f32 %v2011_v0, %v2010_v60  ;;  %2217 = vmatmul.mubr.f32.gmra.mrb[6].mxu1 %v945_v61 }
 0x11a   :  { %2394 = vmatpush3.bf16.msra.mxu1 %v2391_v52  ;;  %v790_v56 = vpop.permute.xlu0 %789 }
 0x11b   :  { %v876_v4 = vmul.f32 %v2012_v2, %v755_v3  ;;  %v914_v5 = vadd.f32 %v2836_v50, %v875_v1  ;;  %2396 = vmatprep.subr.bf16.mxu1 %v2395_v62  ;;  %v795_v60 = vpop.permute.xlu1 %794 }
 0x11d   :  { %v2013_v6 = vpop.f32.mrb[20].mxu0  ;;  %v946_v7 = vmax.f32 %v914_v5, 0.0  ;;  %v915_v8 = vadd.f32 %v2836_v50, %v876_v4 }
 0x11e   :  { %v2014_v9 = vpop.f32.mrb[21].mxu0  ;;  %2398 = vmatpush3.bf16.msra.mxu1 %v2395_v62 }
 0x11f   :  { %v2015_v10 = vadd.f32 %v2014_v9, %v2013_v6  ;;  %v2016_v11 = vpop.f32.mrb[22].mxu0  ;;  %2219 = vmatprep.mubr.f32.mxu1 %v946_v7  ;;  %v947_v12 = vmax.f32 %v915_v8, 0.0  ;;  %v800_v6 = vpop.permute.xlu0 %799 }
 0x120   :  { %v2017_v14 = vpop.f32.mrb[23].mxu0 }
 0x121   :  { %v877_v15 = vmul.f32 %v2015_v10, %v760_v13  ;;  %v2018_v16 = vadd.f32 %v2017_v14, %v2016_v11  ;;  %2220 = vmatmul.mubr.f32.gmra.mrb[8].mxu1 %v947_v12  ;;  %v805_v10 = vpop.permute.xlu1 %804 }
 0x123   :  { %v878_v18 = vmul.f32 %v2018_v16, %v765_v17  ;;  %v916_v19 = vadd.f32 %v2836_v50, %v877_v15 }
 0x125   :  { %v2019_v20 = vpop.f32.mrb[24].mxu0  ;;  %v948_v21 = vmax.f32 %v916_v19, 0.0  ;;  %v917_v22 = vadd.f32 %v2836_v50, %v878_v18 }
 0x126   :  { %v2020_v23 = vpop.f32.mrb[25].mxu0 }
 0x127   :  { %v2021_v24 = vadd.f32 %v2020_v23, %v2019_v20  ;;  %v2022_v25 = vpop.f32.mrb[26].mxu0  ;;  %2222 = vmatprep.mubr.f32.mxu1 %v948_v21  ;;  %v949_v26 = vmax.f32 %v917_v22, 0.0  ;;  %v810_v20 = vpop.permute.xlu0 %809 }
 0x128   :  { %v2023_v28 = vpop.f32.mrb[27].mxu0 }
 0x129   :  { %v879_v29 = vmul.f32 %v2021_v24, %v770_v27  ;;  %v2024_v30 = vadd.f32 %v2023_v28, %v2022_v25  ;;  %2223 = vmatmul.mubr.f32.gmra.mrb[10].mxu1 %v949_v26  ;;  %v815_v24 = vpop.permute.xlu1 %814 }
 0x12b   :  { %v880_v32 = vmul.f32 %v2024_v30, %v775_v31  ;;  %v918_v33 = vadd.f32 %v2836_v50, %v879_v29 }
 0x12d   :  { %v2025_v34 = vpop.f32.mrb[28].mxu0  ;;  %v950_v35 = vmax.f32 %v918_v33, 0.0  ;;  %v919_v36 = vadd.f32 %v2836_v50, %v880_v32 }
 0x12e   :  { %v2026_v37 = vpop.f32.mrb[29].mxu0 }
 0x12f   :  { %v2027_v38 = vadd.f32 %v2026_v37, %v2025_v34  ;;  %v2028_v39 = vpop.f32.mrb[30].mxu0  ;;  %2225 = vmatprep.mubr.f32.mxu1 %v950_v35  ;;  %v951_v40 = vmax.f32 %v919_v36, 0.0  ;;  %v820_v34 = vpop.permute.xlu0 %819 }
 0x130   :  { %v2029_v42 = vpop.f32.mrb[31].mxu0 }
 0x131   :  { %v881_v43 = vmul.f32 %v2027_v38, %v780_v41  ;;  %v2030_v44 = vadd.f32 %v2029_v42, %v2028_v39  ;;  %2226 = vmatmul.mubr.f32.gmra.mrb[12].mxu1 %v951_v40  ;;  %v825_v38 = vpop.permute.xlu1 %824 }
 0x133   :  { %v882_v46 = vmul.f32 %v2030_v44, %v785_v45  ;;  %v920_v47 = vadd.f32 %v2836_v50, %v881_v43 }
 0x135   :  { %v2031_v48 = vpop.f32.mrb[32].mxu0  ;;  %v952_v49 = vmax.f32 %v920_v47, 0.0  ;;  %v921_v51 = vadd.f32 %v2836_v50, %v882_v46 }
 0x136   :  { %v2032_v52 = vpop.f32.mrb[33].mxu0 }
 0x137   :  { %v2033_v53 = vadd.f32 %v2032_v52, %v2031_v48  ;;  %v2034_v54 = vpop.f32.mrb[34].mxu0  ;;  %2228 = vmatprep.mubr.f32.mxu1 %v952_v49  ;;  %v953_v55 = vmax.f32 %v921_v51, 0.0  ;;  %v830_v48 = vpop.permute.xlu0 %829 }
 0x138   :  { %v2035_v57 = vpop.f32.mrb[35].mxu0 }
 0x139   :  { %v883_v58 = vmul.f32 %v2033_v53, %v790_v56  ;;  %v2036_v59 = vadd.f32 %v2035_v57, %v2034_v54  ;;  %2229 = vmatmul.mubr.f32.gmra.mrb[14].mxu1 %v953_v55  ;;  %v835_v53 = vpop.permute.xlu1 %834 }
 0x13b   :  { %v884_v61 = vmul.f32 %v2036_v59, %v795_v60  ;;  %v922_v62 = vadd.f32 %v2836_v50, %v883_v58 }
 0x13d   :  { %v2037_v63 = vpop.f32.mrb[36].mxu0  ;;  %v954_v0 = vmax.f32 %v922_v62, 0.0  ;;  %v923_v1 = vadd.f32 %v2836_v50, %v884_v61 }
 0x13e   :  { %v2038_v2 = vpop.f32.mrb[37].mxu0 }
 0x13f   :  { %v2039_v3 = vadd.f32 %v2038_v2, %v2037_v63  ;;  %v2040_v4 = vpop.f32.mrb[38].mxu0  ;;  %2231 = vmatprep.mubr.f32.mxu1 %v954_v0  ;;  %v955_v5 = vmax.f32 %v923_v1, 0.0  ;;  %v840_v63 = vpop.permute.xlu0 %839 }
 0x140   :  { %v2041_v7 = vpop.f32.mrb[39].mxu0 }
 0x141   :  { %v885_v8 = vmul.f32 %v2039_v3, %v800_v6  ;;  %v2042_v9 = vadd.f32 %v2041_v7, %v2040_v4  ;;  %2232 = vmatmul.mubr.f32.gmra.mrb[16].mxu1 %v955_v5  ;;  %v845_v3 = vpop.permute.xlu1 %844 }
 0x143   :  { %v886_v11 = vmul.f32 %v2042_v9, %v805_v10  ;;  %v924_v12 = vadd.f32 %v2836_v50, %v885_v8 }
 0x145   :  { %v2043_v13 = vpop.f32.mrb[40].mxu0  ;;  %v956_v14 = vmax.f32 %v924_v12, 0.0  ;;  %v925_v15 = vadd.f32 %v2836_v50, %v886_v11 }
 0x146   :  { %v2044_v16 = vpop.f32.mrb[41].mxu0 }
 0x147   :  { %v2045_v17 = vadd.f32 %v2044_v16, %v2043_v13  ;;  %v2046_v18 = vpop.f32.mrb[42].mxu0  ;;  %2234 = vmatprep.mubr.f32.mxu1 %v956_v14  ;;  %v957_v19 = vmax.f32 %v925_v15, 0.0  ;;  %v850_v13 = vpop.permute.xlu0 %849 }
 0x148   :  { %v2047_v21 = vpop.f32.mrb[43].mxu0 }
 0x149   :  { %v887_v22 = vmul.f32 %v2045_v17, %v810_v20  ;;  %v2048_v23 = vadd.f32 %v2047_v21, %v2046_v18  ;;  %2235 = vmatmul.mubr.f32.gmra.mrb[18].mxu1 %v957_v19  ;;  %v855_v17 = vpop.permute.xlu1 %854 }
 0x14b   :  { %v888_v25 = vmul.f32 %v2048_v23, %v815_v24  ;;  %v926_v26 = vadd.f32 %v2836_v50, %v887_v22 }
 0x14d   :  { %v2049_v27 = vpop.f32.mrb[44].mxu0  ;;  %v958_v28 = vmax.f32 %v926_v26, 0.0  ;;  %v927_v29 = vadd.f32 %v2836_v50, %v888_v25 }
 0x14e   :  { %v2050_v30 = vpop.f32.mrb[45].mxu0 }
 0x14f   :  { %v2051_v31 = vadd.f32 %v2050_v30, %v2049_v27  ;;  %v2052_v32 = vpop.f32.mrb[46].mxu0  ;;  %2237 = vmatprep.mubr.f32.mxu1 %v958_v28  ;;  %v959_v33 = vmax.f32 %v927_v29, 0.0  ;;  %v860_v27 = vpop.permute.xlu0 %859 }
 0x150   :  { %v2053_v35 = vpop.f32.mrb[47].mxu0 }
 0x151   :  { %v889_v36 = vmul.f32 %v2051_v31, %v820_v34  ;;  %v2054_v37 = vadd.f32 %v2053_v35, %v2052_v32  ;;  %2238 = vmatmul.mubr.f32.gmra.mrb[20].mxu1 %v959_v33  ;;  %v865_v31 = vpop.permute.xlu1 %864  ;;  %v1794_v34 = vld [vmem:[%s3014_s4] sm:$0xff]  }
 0x153   :  { %v890_v39 = vmul.f32 %v2054_v37, %v825_v38  ;;  %v928_v40 = vadd.f32 %v2836_v50, %v889_v36  ;;  %v1795_v37 = vunpack.c.l.bf16 %v1794_v34 }
 0x155   :  { %v2055_v41 = vpop.f32.mrb[48].mxu0  ;;  %v960_v42 = vmax.f32 %v928_v40, 0.0  ;;  %v929_v43 = vadd.f32 %v2836_v50, %v890_v39  ;;  %v1937_v39 = vld [vmem:[%s3014_s4 + $0x8] sm:$0xff]   ;;  %v1796_v40 = vunpack.c.h.bf16 %v1794_v34 }
 0x156   :  { %v2056_v44 = vpop.f32.mrb[49].mxu0 }
 0x157   :  { %v2057_v45 = vadd.f32 %v2056_v44, %v2055_v41  ;;  %v2058_v46 = vpop.f32.mrb[50].mxu0  ;;  %2240 = vmatprep.mubr.f32.mxu1 %v960_v42  ;;  %v961_v47 = vmax.f32 %v929_v43, 0.0  ;;  %v1799_v41 = vunpack.c.l.bf16 %v1937_v39  ;;  %v1938_v42 = vld [vmem:[%s3014_s4 + $0x10] sm:$0xff]   ;;  %v1800_v43 = vunpack.c.h.bf16 %v1937_v39 }
 0x158   :  { %v2059_v49 = vpop.f32.mrb[51].mxu0  ;;  %v1803_v44 = vunpack.c.l.bf16 %v1938_v42 }
 0x159   :  { %v891_v51 = vmul.f32 %v2057_v45, %v830_v48  ;;  %v2060_v52 = vadd.f32 %v2059_v49, %v2058_v46  ;;  %2241 = vmatmul.mubr.f32.gmra.mrb[22].mxu1 %v961_v47  ;;  %v1804_v45 = vunpack.c.h.bf16 %v1938_v42  ;;  %v1940_v47 = vld [vmem:[%s3014_s4 + $0x20] sm:$0xff]  }
 0x15a   :  { %v1811_v49 = vunpack.c.l.bf16 %v1940_v47 }
 0x15b   :  { %v892_v54 = vmul.f32 %v2060_v52, %v835_v53  ;;  %v930_v55 = vadd.f32 %v2836_v50, %v891_v51  ;;  %v1941_v51 = vld [vmem:[%s3014_s4 + $0x28] sm:$0xff]   ;;  %v1812_v52 = vunpack.c.h.bf16 %v1940_v47 }
 0x15c   :  { %v1815_v53 = vunpack.c.l.bf16 %v1941_v51 }
 0x15d   :  { %v2061_v56 = vpop.f32.mrb[52].mxu0  ;;  %v962_v57 = vmax.f32 %v930_v55, 0.0  ;;  %v931_v58 = vadd.f32 %v2836_v50, %v892_v54  ;;  %v1942_v54 = vld [vmem:[%s3014_s4 + $0x30] sm:$0xff]   ;;  %v1816_v55 = vunpack.c.h.bf16 %v1941_v51 }
 0x15e   :  { %v2062_v59 = vpop.f32.mrb[53].mxu0 }
 0x15f   :  { %v2063_v60 = vadd.f32 %v2062_v59, %v2061_v56  ;;  %v2064_v61 = vpop.f32.mrb[54].mxu0  ;;  %2243 = vmatprep.mubr.f32.mxu1 %v962_v57  ;;  %v963_v62 = vmax.f32 %v931_v58, 0.0  ;;  %v1819_v56 = vunpack.c.l.bf16 %v1942_v54  ;;  %v1943_v57 = vld [vmem:[%s3014_s4 + $0x38] sm:$0xff]   ;;  %v1820_v58 = vunpack.c.h.bf16 %v1942_v54 }
 0x160   :  { %v2065_v0 = vpop.f32.mrb[55].mxu0  ;;  %v1823_v59 = vunpack.c.l.bf16 %v1943_v57 }
 0x161   :  { %v893_v1 = vmul.f32 %v2063_v60, %v840_v63  ;;  %v2066_v2 = vadd.f32 %v2065_v0, %v2064_v61  ;;  %2244 = vmatmul.mubr.f32.gmra.mrb[24].mxu1 %v963_v62  ;;  %v1944_v60 = vld [vmem:[%s3014_s4 + $0x40] sm:$0xff]   ;;  %v1824_v61 = vunpack.c.h.bf16 %v1943_v57  ;;  %v1945_v63 = vld [vmem:[%s3014_s4 + $0x48] sm:$0xff]  }
 0x162   :  { %v1827_v62 = vunpack.c.l.bf16 %v1944_v60  ;;  %v1828_v0 = vunpack.c.h.bf16 %v1944_v60 }
 0x163   :  { %v894_v4 = vmul.f32 %v2066_v2, %v845_v3  ;;  %v932_v5 = vadd.f32 %v2836_v50, %v893_v1  ;;  %v1831_v1 = vunpack.c.l.bf16 %v1945_v63  ;;  %v1946_v2 = vld [vmem:[%s3014_s4 + $0x50] sm:$0xff]   ;;  %v1832_v3 = vunpack.c.h.bf16 %v1945_v63 }
 0x165   :  { %v2067_v6 = vpop.f32.mrb[56].mxu0  ;;  %v964_v7 = vmax.f32 %v932_v5, 0.0  ;;  %v933_v8 = vadd.f32 %v2836_v50, %v894_v4  ;;  %v1835_v4 = vunpack.c.l.bf16 %v1946_v2  ;;  %v1947_v5 = vld [vmem:[%s3014_s4 + $0x58] sm:$0xff]  }
 0x166   :  { %v2068_v9 = vpop.f32.mrb[57].mxu0 }
 0x167   :  { %v2069_v10 = vadd.f32 %v2068_v9, %v2067_v6  ;;  %v2070_v11 = vpop.f32.mrb[58].mxu0  ;;  %2246 = vmatprep.mubr.f32.mxu1 %v964_v7  ;;  %v965_v12 = vmax.f32 %v933_v8, 0.0  ;;  %v1836_v6 = vunpack.c.h.bf16 %v1946_v2  ;;  %v1839_v7 = vunpack.c.l.bf16 %v1947_v5  ;;  %v1948_v8 = vld [vmem:[%s3014_s4 + $0x60] sm:$0xff]  }
 0x168   :  { %v2071_v14 = vpop.f32.mrb[59].mxu0  ;;  %v1840_v9 = vunpack.c.h.bf16 %v1947_v5 }
 0x169   :  { %v895_v15 = vmul.f32 %v2069_v10, %v850_v13  ;;  %v2072_v16 = vadd.f32 %v2071_v14, %v2070_v11  ;;  %2247 = vmatmul.mubr.f32.gmra.mrb[26].mxu1 %v965_v12  ;;  %v1843_v10 = vunpack.c.l.bf16 %v1948_v8  ;;  %v1949_v11 = vld [vmem:[%s3014_s4 + $0x68] sm:$0xff]   ;;  %v1844_v12 = vunpack.c.h.bf16 %v1948_v8  ;;  %v1950_v14 = vld [vmem:[%s3014_s4 + $0x70] sm:$0xff]  }
 0x16a   :  { %v1847_v13 = vunpack.c.l.bf16 %v1949_v11 }
 0x16b   :  { %v896_v18 = vmul.f32 %v2072_v16, %v855_v17  ;;  %v934_v19 = vadd.f32 %v2836_v50, %v895_v15  ;;  %v1848_v15 = vunpack.c.h.bf16 %v1949_v11  ;;  %v1851_v16 = vunpack.c.l.bf16 %v1950_v14  ;;  %v1951_v17 = vld [vmem:[%s3014_s4 + $0x78] sm:$0xff]  }
 0x16d   :  { %v2073_v20 = vpop.f32.mrb[60].mxu0  ;;  %v966_v21 = vmax.f32 %v934_v19, 0.0  ;;  %v935_v22 = vadd.f32 %v2836_v50, %v896_v18  ;;  %v1852_v18 = vunpack.c.h.bf16 %v1950_v14  ;;  %v1855_v19 = vunpack.c.l.bf16 %v1951_v17 }
 0x16e   :  { %v2074_v23 = vpop.f32.mrb[61].mxu0 }
 0x16f   :  { %v2075_v24 = vadd.f32 %v2074_v23, %v2073_v20  ;;  %v2076_v25 = vpop.f32.mrb[62].mxu0  ;;  %2249 = vmatprep.mubr.f32.mxu1 %v966_v21  ;;  %v967_v26 = vmax.f32 %v935_v22, 0.0  ;;  %v1856_v20 = vunpack.c.h.bf16 %v1951_v17 }
 0x170   :  { %v2077_v28 = vpop.f32.mrb[63].mxu0 }
 0x171   :  { %v897_v29 = vmul.f32 %v2075_v24, %v860_v27  ;;  %v2078_v30 = vadd.f32 %v2077_v28, %v2076_v25  ;;  %2250 = vmatmul.mubr.f32.gmra.mrb[28].mxu1 %v967_v26 }
 0x173   :  { %v898_v32 = vmul.f32 %v2078_v30, %v865_v31  ;;  %v936_v33 = vadd.f32 %v2836_v50, %v897_v29 }
 0x175   :  { %v968_v35 = vmax.f32 %v936_v33, 0.0  ;;  %v937_v36 = vadd.f32 %v2836_v50, %v898_v32  ;;  %v1939_v50 = vld [vmem:[%s3014_s4 + $0x18] sm:$0xff]  }
 0x176   :  { %v1807_v46 = vunpack.c.l.bf16 %v1939_v50  ;;  %v1808_v48 = vunpack.c.h.bf16 %v1939_v50 }
 0x177   :  { %2252 = vmatprep.mubr.f32.mxu1 %v968_v35  ;;  %v969_v38 = vmax.f32 %v937_v36, 0.0 }
 0x179   :  { %2253 = vmatmul.mubr.f32.gmra.mrb[30].mxu1 %v969_v38 }
 0x17a   :  { %2287 = vmatprep.mubr.f32.mxu1 %v1795_v37 }
 0x17d   :  { %2288 = vmatmul.mubr.f32.vlgmr.msra.gmra.mrb[0].mxu1 %v1796_v40 }
 0x17e   :  { %2290 = vmatprep.mubr.f32.mxu1 %v1799_v41 }
 0x181   :  { %2291 = vmatmul.mubr.f32.gmra.mrb[2].mxu1 %v1800_v43 }
 0x182   :  { %2293 = vmatprep.mubr.f32.mxu1 %v1803_v44 }
 0x185   :  { %2294 = vmatmul.mubr.f32.gmra.mrb[4].mxu1 %v1804_v45 }
 0x186   :  { %2296 = vmatprep.mubr.f32.mxu1 %v1807_v46 }
 0x189   :  { %2297 = vmatmul.mubr.f32.gmra.mrb[6].mxu1 %v1808_v48 }
 0x18a   :  { %2299 = vmatprep.mubr.f32.mxu1 %v1811_v49 }
 0x18d   :  { %2300 = vmatmul.mubr.f32.gmra.mrb[8].mxu1 %v1812_v52 }
 0x18e   :  { %2302 = vmatprep.mubr.f32.mxu1 %v1815_v53 }
 0x191   :  { %2303 = vmatmul.mubr.f32.gmra.mrb[10].mxu1 %v1816_v55 }
 0x192   :  { %2305 = vmatprep.mubr.f32.mxu1 %v1819_v56 }
 0x195   :  { %2306 = vmatmul.mubr.f32.gmra.mrb[12].mxu1 %v1820_v58 }
 0x196   :  { %2308 = vmatprep.mubr.f32.mxu1 %v1823_v59 }
 0x199   :  { %2309 = vmatmul.mubr.f32.gmra.mrb[14].mxu1 %v1824_v61 }
 0x19a   :  { %2311 = vmatprep.mubr.f32.mxu1 %v1827_v62 }
 0x19d   :  { %2312 = vmatmul.mubr.f32.gmra.mrb[16].mxu1 %v1828_v0 }
 0x19e   :  { %2314 = vmatprep.mubr.f32.mxu1 %v1831_v1 }
 0x1a1   :  { %2315 = vmatmul.mubr.f32.gmra.mrb[18].mxu1 %v1832_v3 }
 0x1a2   :  { %2317 = vmatprep.mubr.f32.mxu1 %v1835_v4 }
 0x1a5   :  { %2318 = vmatmul.mubr.f32.gmra.mrb[20].mxu1 %v1836_v6 }
 0x1a6   :  { %2320 = vmatprep.mubr.f32.mxu1 %v1839_v7 }
 0x1a9   :  { %2321 = vmatmul.mubr.f32.gmra.mrb[22].mxu1 %v1840_v9 }
 0x1aa   :  { %2323 = vmatprep.mubr.f32.mxu1 %v1843_v10 }
 0x1ad   :  { %2324 = vmatmul.mubr.f32.gmra.mrb[24].mxu1 %v1844_v12 }
 0x1ae   :  { %2326 = vmatprep.mubr.f32.mxu1 %v1847_v13 }
 0x1b1   :  { %2327 = vmatmul.mubr.f32.gmra.mrb[26].mxu1 %v1848_v15 }
 0x1b2   :  { %2329 = vmatprep.mubr.f32.mxu1 %v1851_v16 }
 0x1b5   :  { %2330 = vmatmul.mubr.f32.gmra.mrb[28].mxu1 %v1852_v18 }
 0x1b6   :  { %2332 = vmatprep.mubr.f32.mxu1 %v1855_v19 }
 0x1b9   :  { %2333 = vmatmul.mubr.f32.gmra.mrb[30].mxu1 %v1856_v20 }
 0x250   :  { %v2289_v21 = vpop.f32.mrb[0].mxu1 }
 0x251   :  { %v1357_v22 = vpop.f32.mrb[1].mxu1 }
 0x252   :  { %v1860_v23 = vpack.c.bf16 %v2289_v21, %v1357_v22 }
 0x254   :  { %1861 = vst [vmem:[%s3015_s7] sm:$0xff] %v1860_v23   ;;  %v2292_v24 = vpop.f32.mrb[2].mxu1 }
 0x255   :  { %v1367_v25 = vpop.f32.mrb[3].mxu1 }
 0x256   :  { %v1865_v26 = vpack.c.bf16 %v2292_v24, %v1367_v25 }
 0x258   :  { %1952 = vst [vmem:[%s3015_s7 + $0x8] sm:$0xff] %v1865_v26   ;;  %v2295_v27 = vpop.f32.mrb[4].mxu1 }
 0x259   :  { %v1377_v28 = vpop.f32.mrb[5].mxu1 }
 0x25a   :  { %v1870_v29 = vpack.c.bf16 %v2295_v27, %v1377_v28 }
 0x25c   :  { %1953 = vst [vmem:[%s3015_s7 + $0x10] sm:$0xff] %v1870_v29   ;;  %v2298_v30 = vpop.f32.mrb[6].mxu1 }
 0x25d   :  { %v1387_v31 = vpop.f32.mrb[7].mxu1 }
 0x25e   :  { %v1875_v32 = vpack.c.bf16 %v2298_v30, %v1387_v31 }
 0x260   :  { %1954 = vst [vmem:[%s3015_s7 + $0x18] sm:$0xff] %v1875_v32   ;;  %v2301_v33 = vpop.f32.mrb[8].mxu1 }
 0x261   :  { %v1397_v34 = vpop.f32.mrb[9].mxu1 }
 0x262   :  { %v1880_v35 = vpack.c.bf16 %v2301_v33, %v1397_v34 }
 0x264   :  { %1955 = vst [vmem:[%s3015_s7 + $0x20] sm:$0xff] %v1880_v35   ;;  %v2304_v36 = vpop.f32.mrb[10].mxu1 }
 0x265   :  { %v1407_v37 = vpop.f32.mrb[11].mxu1 }
 0x266   :  { %v1885_v38 = vpack.c.bf16 %v2304_v36, %v1407_v37 }
 0x268   :  { %1956 = vst [vmem:[%s3015_s7 + $0x28] sm:$0xff] %v1885_v38   ;;  %v2307_v39 = vpop.f32.mrb[12].mxu1 }
 0x269   :  { %v1417_v40 = vpop.f32.mrb[13].mxu1 }
 0x26a   :  { %v1890_v41 = vpack.c.bf16 %v2307_v39, %v1417_v40 }
 0x26c   :  { %1957 = vst [vmem:[%s3015_s7 + $0x30] sm:$0xff] %v1890_v41   ;;  %v2310_v42 = vpop.f32.mrb[14].mxu1 }
 0x26d   :  { %v1427_v43 = vpop.f32.mrb[15].mxu1 }
 0x26e   :  { %v1895_v44 = vpack.c.bf16 %v2310_v42, %v1427_v43 }
 0x270   :  { %1958 = vst [vmem:[%s3015_s7 + $0x38] sm:$0xff] %v1895_v44   ;;  %v2313_v50 = vpop.f32.mrb[16].mxu1 }
 0x271   :  { %v1437_v45 = vpop.f32.mrb[17].mxu1 }
 0x272   :  { %v1900_v46 = vpack.c.bf16 %v2313_v50, %v1437_v45 }
 0x274   :  { %1959 = vst [vmem:[%s3015_s7 + $0x40] sm:$0xff] %v1900_v46   ;;  %v2316_v47 = vpop.f32.mrb[18].mxu1 }
 0x275   :  { %v1447_v48 = vpop.f32.mrb[19].mxu1 }
 0x276   :  { %v1905_v49 = vpack.c.bf16 %v2316_v47, %v1447_v48 }
 0x278   :  { %1960 = vst [vmem:[%s3015_s7 + $0x48] sm:$0xff] %v1905_v49   ;;  %v2319_v51 = vpop.f32.mrb[20].mxu1 }
 0x279   :  { %v1457_v52 = vpop.f32.mrb[21].mxu1 }
 0x27a   :  { %v1910_v53 = vpack.c.bf16 %v2319_v51, %v1457_v52 }
 0x27c   :  { %1961 = vst [vmem:[%s3015_s7 + $0x50] sm:$0xff] %v1910_v53   ;;  %v2322_v54 = vpop.f32.mrb[22].mxu1 }
 0x27d   :  { %v1467_v55 = vpop.f32.mrb[23].mxu1 }
 0x27e   :  { %v1915_v56 = vpack.c.bf16 %v2322_v54, %v1467_v55 }
 0x280   :  { %1962 = vst [vmem:[%s3015_s7 + $0x58] sm:$0xff] %v1915_v56   ;;  %v2325_v57 = vpop.f32.mrb[24].mxu1 }
 0x281   :  { %v1477_v58 = vpop.f32.mrb[25].mxu1 }
 0x282   :  { %v1920_v59 = vpack.c.bf16 %v2325_v57, %v1477_v58 }
 0x284   :  { %1963 = vst [vmem:[%s3015_s7 + $0x60] sm:$0xff] %v1920_v59   ;;  %v2328_v60 = vpop.f32.mrb[26].mxu1 }
 0x285   :  { %v1487_v61 = vpop.f32.mrb[27].mxu1 }
 0x286   :  { %v1925_v62 = vpack.c.bf16 %v2328_v60, %v1487_v61 }
 0x288   :  { %1964 = vst [vmem:[%s3015_s7 + $0x68] sm:$0xff] %v1925_v62   ;;  %v2331_v63 = vpop.f32.mrb[28].mxu1 }
 0x289   :  { %v1497_v0 = vpop.f32.mrb[29].mxu1 }
 0x28a   :  { %v1930_v1 = vpack.c.bf16 %v2331_v63, %v1497_v0 }
 0x28c   :  { %1965 = vst [vmem:[%s3015_s7 + $0x70] sm:$0xff] %v1930_v1   ;;  %v2334_v2 = vpop.f32.mrb[30].mxu1 }
 0x28d   :  { %v1507_v3 = vpop.f32.mrb[31].mxu1 }
 0x28e   :  { %v1935_v4 = vpack.c.bf16 %v2334_v2, %v1507_v3 }
 0x290   :  { %1966 = vst [vmem:[%s3015_s7 + $0x78] sm:$0xff] %v1935_v4  }

// kernel: jknet_forward.3
= control target key start
LH: loop header
LB: loop body
LE: loop exit
PB: predicated region body
PF: predicated region fallthrough
CT: control target
= control target key end

     0   :  { %v2481_v1 = vmov 0   ;;  %s3185_s1 = inlined_call_operand.vmem [shape: bf16[256,128], index: 1, kind: input, shape index: {}]   ;;  %s3186_s0 = inlined_call_operand.vmem [shape: bf16[256,256], index: 0, kind: input, shape index: {}]   ;;  %s3187_s2 = inlined_call_operand.vmem [shape: f32[256,1], index: 2, kind: input, shape index: {}]   ;;  %s3188_s4 = inlined_call_operand.vmem [shape: f32[128,128], index: 4, kind: input, shape index: {}]   ;;  %s3189_s3 = inlined_call_operand.vmem [shape: f32[1,128], index: 3, kind: input, shape index: {}]   ;;  %s3190_s5 = inlined_call_operand.vmem [shape: bf16[256,128], index: 5, kind: output, shape index: {0}]   ;;  %s3191_s6 = inlined_call_operand.vmem [shape: bf16[256,128], index: 6, kind: output, shape index: {1}]  }
   0x1   :  { %v2417_v0 = vld [vmem:[%s3185_s1 + $0x40] sm:$0xff]   ;;  %2415 = vset.pattern.permute.xlu0 %v2481_v1  ;;  %2416 = vset.pattern.permute.xlu1 %v2481_v1  ;;  %v2419_v3 = vld [vmem:[%s3185_s1 + $0x48] sm:$0xff]   ;;  %v2421_v5 = vld [vmem:[%s3185_s1 + $0x50] sm:$0xff]  }
   0x2   :  { %v2418_v2 = vld [vmem:[%s3185_s1] sm:$0xff]   ;;  %2126 = vmatprep.subr.bf16.mxu0 %v2417_v0  ;;  %2398 = vmatprep.subr.bf16.mxu1 %v2417_v0  ;;  %v2420_v4 = vld [vmem:[%s3185_s1 + $0x8] sm:$0xff]   ;;  %v2422_v6 = vld [vmem:[%s3185_s1 + $0x10] sm:$0xff]  }
   0x3   :  { %2127 = vmatpush3.bf16.msra.mxu0 %v2418_v2  ;;  %2406 = vmatpush3.bf16.msra.mxu1 %v2418_v2  ;;  %v2423_v7 = vld [vmem:[%s3185_s1 + $0x58] sm:$0xff]   ;;  %v2425_v9 = vld [vmem:[%s3185_s1 + $0x60] sm:$0xff]   ;;  %v2427_v11 = vld [vmem:[%s3185_s1 + $0x68] sm:$0xff]  }
   0x4   :  { %2128 = vmatprep.subr.bf16.mxu0 %v2419_v3  ;;  %2399 = vmatprep.subr.bf16.mxu1 %v2419_v3  ;;  %v2424_v8 = vld [vmem:[%s3185_s1 + $0x18] sm:$0xff]   ;;  %v2426_v10 = vld [vmem:[%s3185_s1 + $0x20] sm:$0xff]   ;;  %v2428_v14 = vld [vmem:[%s3185_s1 + $0x28] sm:$0xff]  }
   0x5   :  { %v2435_v12 = vld [vmem:[%s3186_s0 + $0x4] ss:$8 sps:$4 sm:$0xff]   ;;  %v2565_v15 = vld [vmem:[%s3187_s2 + $0x10] sm:$0xff]  ;;  %v2580_v18 = vld [vmem:[%s3187_s2 + $0x18] sm:$0xff] }
   0x6   :  { %v2556_v13 = vld [vmem:[%s3187_s2] sm:$0xff]  ;;  %443 = vmatprep.mubr.bf16.mxu0 %v2435_v12  ;;  %v2570_v16 = vld [vmem:[%s3187_s2 + $0x8] sm:$0xff]  ;;  %v2429_v17 = vld [vmem:[%s3185_s1 + $0x70] sm:$0xff]   ;;  %715 = vperm.xlu1 %2416, %v2565_v15  }
   0x7   :  { %2129 = vmatpush3.bf16.msra.mxu0 %v2420_v4  ;;  %2407 = vmatpush3.bf16.msra.mxu1 %v2420_v4  ;;  %v2443_v19 = vld [vmem:[%s3186_s0 + $0xc4] ss:$8 sps:$4 sm:$0xff]   ;;  %v2430_v20 = vld [vmem:[%s3185_s1 + $0x30] sm:$0xff]   ;;  %v2431_v22 = vld [vmem:[%s3185_s1 + $0x78] sm:$0xff]  }
   0x8   :  { %2130 = vmatprep.subr.bf16.mxu0 %v2421_v5  ;;  %2400 = vmatprep.subr.bf16.mxu1 %v2421_v5  ;;  %v2591_v21 = vld [vmem:[%s3187_s2 + $0x20] sm:$0xff]  ;;  %v2601_v23 = vld [vmem:[%s3187_s2 + $0x28] sm:$0xff]  ;;  %v2432_v24 = vld [vmem:[%s3185_s1 + $0x38] sm:$0xff]  }
   0x9   :  { %705 = vperm.xlu0 %2415, %v2556_v13   ;;  %539 = vmatprep.mubr.bf16.mxu1 %v2443_v19  ;;  %v2609_v25 = vld [vmem:[%s3187_s2 + $0x30] sm:$0xff]  ;;  %v2433_v26 = vld [vmem:[%s3186_s0] ss:$8 sps:$4 sm:$0xff]   ;;  %v2619_v27 = vld [vmem:[%s3187_s2 + $0x38] sm:$0xff] }
   0xa   :  { %720 = vperm.xlu1 %2416, %v2580_v18   ;;  %v2436_v28 = vld [vmem:[%s3186_s0 + $0x14] ss:$8 sps:$4 sm:$0xff]   ;;  %v2441_v29 = vld [vmem:[%s3186_s0 + $0xc0] ss:$8 sps:$4 sm:$0xff]   ;;  %v2438_v34 = vld [vmem:[%s3186_s0 + $0x10] ss:$8 sps:$4 sm:$0xff]  }
   0xb   :  { %2131 = vmatpush3.bf16.msra.mxu0 %v2422_v6  ;;  %2408 = vmatpush3.bf16.msra.mxu1 %v2422_v6  ;;  %v2630_v30 = vld [vmem:[%s3187_s2 + $0x40] sm:$0xff]  ;;  %v2447_v31 = vld [vmem:[%s3186_s0 + $0xd4] ss:$8 sps:$4 sm:$0xff]   ;;  %v2640_v32 = vld [vmem:[%s3187_s2 + $0x48] sm:$0xff] }
   0xc   :  { %2132 = vmatprep.subr.bf16.mxu0 %v2423_v7  ;;  %2401 = vmatprep.subr.bf16.mxu1 %v2423_v7  ;;  %v2645_v33 = vld [vmem:[%s3187_s2 + $0x50] sm:$0xff]  ;;  %v2439_v35 = vld [vmem:[%s3186_s0 + $0x24] ss:$8 sps:$4 sm:$0xff]   ;;  %v2661_v37 = vld [vmem:[%s3187_s2 + $0x58] sm:$0xff] }
   0xd   :  { %710 = vperm.xlu0 %2415, %v2570_v16   ;;  %v2450_v36 = vld [vmem:[%s3186_s0 + $0xd0] ss:$8 sps:$4 sm:$0xff]   ;;  %v2666_v38 = vld [vmem:[%s3187_s2 + $0x60] sm:$0xff]  ;;  %v2676_v40 = vld [vmem:[%s3187_s2 + $0x68] sm:$0xff] }
   0xe   :  { %730 = vperm.xlu1 %2416, %v2601_v23   ;;  %v2453_v39 = vld [vmem:[%s3186_s0 + $0xe4] ss:$8 sps:$4 sm:$0xff]   ;;  %v2681_v41 = vld [vmem:[%s3187_s2 + $0x70] sm:$0xff]  ;;  %v2444_v42 = vld [vmem:[%s3186_s0 + $0x20] ss:$8 sps:$4 sm:$0xff]  }
   0xf   :  { %2133 = vmatpush3.bf16.msra.mxu0 %v2424_v8  ;;  %2409 = vmatpush3.bf16.msra.mxu1 %v2424_v8  ;;  %v2445_v43 = vld [vmem:[%s3186_s0 + $0x34] ss:$8 sps:$4 sm:$0xff]   ;;  %v2456_v45 = vld [vmem:[%s3186_s0 + $0xe0] ss:$8 sps:$4 sm:$0xff]   ;;  %v2449_v50 = vld [vmem:[%s3186_s0 + $0x30] ss:$8 sps:$4 sm:$0xff]  }
  0x10   :  { %2134 = vmatprep.subr.bf16.mxu0 %v2425_v9  ;;  %2402 = vmatprep.subr.bf16.mxu1 %v2425_v9  ;;  %v2694_v44 = vld [vmem:[%s3187_s2 + $0x78] sm:$0xff]  ;;  %v2702_v46 = vld [vmem:[%s3187_s2 + $0x80] sm:$0xff]  ;;  %v2712_v48 = vld [vmem:[%s3187_s2 + $0x88] sm:$0xff] }
  0x11   :  { %725 = vperm.xlu0 %2415, %v2591_v21   ;;  %v2459_v47 = vld [vmem:[%s3186_s0 + $0xf4] ss:$8 sps:$4 sm:$0xff]   ;;  %v2451_v52 = vld [vmem:[%s3186_s0 + $0x44] ss:$8 sps:$4 sm:$0xff]   ;;  %v2462_v53 = vld [vmem:[%s3186_s0 + $0xf0] ss:$8 sps:$4 sm:$0xff]  }
  0x12   :  { %740 = vperm.xlu1 %2416, %v2619_v27   ;;  %v2717_v49 = vld [vmem:[%s3187_s2 + $0x90] sm:$0xff]  ;;  %v2727_v51 = vld [vmem:[%s3187_s2 + $0x98] sm:$0xff]  ;;  %v2738_v54 = vld [vmem:[%s3187_s2 + $0xa0] sm:$0xff] }
  0x13   :  { %2135 = vmatpush3.bf16.msra.mxu0 %v2426_v10  ;;  %2410 = vmatpush3.bf16.msra.mxu1 %v2426_v10  ;;  %v2745_v55 = vld [vmem:[%s3187_s2 + $0xa8] sm:$0xff]  ;;  %v2750_v56 = vld [vmem:[%s3187_s2 + $0xb0] sm:$0xff]  ;;  %v2760_v58 = vld [vmem:[%s3187_s2 + $0xb8] sm:$0xff] }
  0x14   :  { %2136 = vmatprep.subr.bf16.mxu0 %v2427_v11  ;;  %2403 = vmatprep.subr.bf16.mxu1 %v2427_v11  ;;  %v2455_v57 = vld [vmem:[%s3186_s0 + $0x40] ss:$8 sps:$4 sm:$0xff]   ;;  %v2457_v59 = vld [vmem:[%s3186_s0 + $0x54] ss:$8 sps:$4 sm:$0xff]   ;;  %v2461_v63 = vld [vmem:[%s3186_s0 + $0x50] ss:$8 sps:$4 sm:$0xff]  }
  0x15   :  { %735 = vperm.xlu0 %2415, %v2609_v25   ;;  %v2768_v60 = vld [vmem:[%s3187_s2 + $0xc0] sm:$0xff]  ;;  %v2775_v61 = vld [vmem:[%s3187_s2 + $0xc8] sm:$0xff]  ;;  %v2780_v62 = vld [vmem:[%s3187_s2 + $0xd0] sm:$0xff] }
  0x16   :  { %750 = vperm.xlu1 %2416, %v2640_v32   ;;  %v2790_v0 = vld [vmem:[%s3187_s2 + $0xd8] sm:$0xff]  ;;  %v2463_v1 = vld [vmem:[%s3186_s0 + $0x64] ss:$8 sps:$4 sm:$0xff]   ;;  %v2816_v6 = vld [vmem:[%s3187_s2 + $0xf0] sm:$0xff] }
  0x17   :  { %2137 = vmatpush3.bf16.msra.mxu0 %v2428_v14  ;;  %2411 = vmatpush3.bf16.msra.mxu1 %v2428_v14  ;;  %v2798_v2 = vld [vmem:[%s3187_s2 + $0xe0] sm:$0xff]  ;;  %v2805_v3 = vld [vmem:[%s3187_s2 + $0xe8] sm:$0xff]  ;;  %v1160_v8 = vld [vmem:[%s3188_s4 + $0x10] sm:$0xff] }
  0x18   :  { %2138 = vmatprep.subr.bf16.mxu0 %v2429_v17  ;;  %2404 = vmatprep.subr.bf16.mxu1 %v2429_v17  ;;  %v1158_v4 = vld [vmem:[%s3188_s4] sm:$0xff]  ;;  %v1159_v5 = vld [vmem:[%s3188_s4 + $0x8] sm:$0xff]  ;;  %v1161_v9 = vld [vmem:[%s3188_s4 + $0x18] sm:$0xff] }
  0x19   :  { %745 = vperm.xlu0 %2415, %v2630_v30   ;;  %v2366_v7 = vpack.c.bf16 %v1159_v5, %v1158_v4  ;;  %v2465_v10 = vld [vmem:[%s3186_s0 + $0x60] ss:$8 sps:$4 sm:$0xff]   ;;  %v2832_v11 = vld [vmem:[%s3187_s2 + $0xf8] sm:$0xff]  ;;  %v2370_v12 = vpack.c.bf16 %v1161_v9, %v1160_v8 }
  0x1a   :  { %760 = vperm.xlu1 %2416, %v2661_v37   ;;  %v2466_v14 = vld [vmem:[%s3186_s0 + $0x74] ss:$8 sps:$4 sm:$0xff]   ;;  %v1162_v17 = vld [vmem:[%s3188_s4 + $0x20] sm:$0xff]  ;;  %v1163_v19 = vld [vmem:[%s3188_s4 + $0x28] sm:$0xff] }
  0x1b   :  { %2139 = vmatpush3.bf16.msra.mxu0 %v2430_v20  ;;  %2412 = vmatpush3.bf16.msra.mxu1 %v2430_v20  ;;  %v2374_v20 = vpack.c.bf16 %v1163_v19, %v1162_v17  ;;  %v2978_v8 = vld [vmem:[%s3189_s3] ss:$0 sm:$0xff] }
  0x1c   :  { %2140 = vmatprep.subr.bf16.mxu0 %v2431_v22  ;;  %2405 = vmatprep.subr.bf16.mxu1 %v2431_v22  ;;  %v1164_v22 = vld [vmem:[%s3188_s4 + $0x30] sm:$0xff] }
  0x1d   :  { %755 = vperm.xlu0 %2415, %v2645_v33  }
  0x1e   :  { %770 = vperm.xlu1 %2416, %v2676_v40  }
  0x1f   :  { %2141 = vmatpush3.bf16.msra.mxu0 %v2432_v24  ;;  %2413 = vmatpush3.bf16.msra.mxu1 %v2432_v24  ;;  %v1165_v24 = vld [vmem:[%s3188_s4 + $0x38] sm:$0xff] }
  0x20   :  { %2367 = vmatprep.subr.bf16.mxu1 %v2366_v7 }
  0x21   :  { %765 = vperm.xlu0 %2415, %v2666_v38  }
  0x22   :  { %444 = vmatmul.mubr.bf16.vlgmr.msra.gmra.mrb[0].mxu0 %v2433_v26  ;;  %540 = vmatmul.mubr.bf16.vlgmr.msra.gmra.mrb[0].mxu1 %v2441_v29  ;;  %v2468_v26 = vld [vmem:[%s3186_s0 + $0x70] ss:$8 sps:$4 sm:$0xff]   ;;  %v1167_v29 = vld [vmem:[%s3188_s4 + $0x48] sm:$0xff] }
  0x23   :  { %451 = vmatprep.mubr.bf16.mxu0 %v2436_v28  ;;  %547 = vmatprep.mubr.bf16.mxu1 %v2447_v31  ;;  %v2469_v28 = vld [vmem:[%s3186_s0 + $0x84] ss:$8 sps:$4 sm:$0xff]   ;;  %v2472_v31 = vld [vmem:[%s3186_s0 + $0x94] ss:$8 sps:$4 sm:$0xff]  }
  0x24   :  { %780 = vperm.xlu1 %2416, %v2694_v44   ;;  %2369 = vmatpush3.bf16.msra.mxu1 %v2366_v7 }
  0x25   :  { %775 = vperm.xlu0 %2415, %v2681_v41   ;;  %2371 = vmatprep.subr.bf16.mxu1 %v2370_v12 }
  0x28   :  { %790 = vperm.xlu1 %2416, %v2712_v48   ;;  %2373 = vmatpush3.bf16.msra.mxu1 %v2370_v12 }
  0x29   :  { %785 = vperm.xlu0 %2415, %v2702_v46   ;;  %2375 = vmatprep.subr.bf16.mxu1 %v2374_v20 }
  0x2a   :  { %452 = vmatmul.mubr.bf16.gmra.mrb[4].mxu0 %v2438_v34  ;;  %548 = vmatmul.mubr.bf16.gmra.mrb[4].mxu1 %v2450_v36  ;;  %v2480_v34 = vld [vmem:[%s3186_s0 + $0xb0] ss:$8 sps:$4 sm:$0xff]   ;;  %v1171_v36 = vld [vmem:[%s3188_s4 + $0x68] sm:$0xff] }
  0x2b   :  { %459 = vmatprep.mubr.bf16.mxu0 %v2439_v35  ;;  %555 = vmatprep.mubr.bf16.mxu1 %v2453_v39  ;;  %v1170_v35 = vld [vmem:[%s3188_s4 + $0x60] sm:$0xff]  ;;  %v1173_v39 = vld [vmem:[%s3188_s4 + $0x78] sm:$0xff] }
  0x2c   :  { %800 = vperm.xlu1 %2416, %v2727_v51   ;;  %2377 = vmatpush3.bf16.msra.mxu1 %v2374_v20 }
  0x2d   :  { %795 = vperm.xlu0 %2415, %v2717_v49  }
  0x30   :  { %810 = vperm.xlu1 %2416, %v2745_v55  }
  0x31   :  { %805 = vperm.xlu0 %2415, %v2738_v54  }
  0x32   :  { %460 = vmatmul.mubr.bf16.gmra.mrb[8].mxu0 %v2444_v42  ;;  %556 = vmatmul.mubr.bf16.gmra.mrb[8].mxu1 %v2456_v45 }
  0x33   :  { %467 = vmatprep.mubr.bf16.mxu0 %v2445_v43  ;;  %563 = vmatprep.mubr.bf16.mxu1 %v2459_v47 }
  0x34   :  { %820 = vperm.xlu1 %2416, %v2760_v58  }
  0x35   :  { %815 = vperm.xlu0 %2415, %v2750_v56  }
  0x38   :  { %830 = vperm.xlu1 %2416, %v2775_v61  }
  0x39   :  { %825 = vperm.xlu0 %2415, %v2768_v60  }
  0x3a   :  { %468 = vmatmul.mubr.bf16.gmra.mrb[12].mxu0 %v2449_v50  ;;  %564 = vmatmul.mubr.bf16.gmra.mrb[12].mxu1 %v2462_v53 }
  0x3b   :  { %475 = vmatprep.mubr.bf16.mxu0 %v2451_v52 }
  0x3c   :  { %840 = vperm.xlu1 %2416, %v2790_v0  }
  0x3d   :  { %835 = vperm.xlu0 %2415, %v2780_v62  }
  0x40   :  { %850 = vperm.xlu1 %2416, %v2805_v3  }
  0x41   :  { %845 = vperm.xlu0 %2415, %v2798_v2  }
  0x42   :  { %476 = vmatmul.mubr.bf16.gmra.mrb[16].mxu0 %v2455_v57 }
  0x43   :  { %483 = vmatprep.mubr.bf16.mxu0 %v2457_v59 }
  0x44   :  { %860 = vperm.xlu1 %2416, %v2832_v11  }
  0x45   :  { %855 = vperm.xlu0 %2415, %v2816_v6  }
  0x48   :  { %1406 = vperm.xlu1 %2416, %v2570_v16   ;;  %v1166_v16 = vld [vmem:[%s3188_s4 + $0x40] sm:$0xff] }
  0x49   :  { %1401 = vperm.xlu0 %2415, %v2556_v13   ;;  %v2378_v13 = vpack.c.bf16 %v1165_v24, %v1164_v22 }
  0x4a   :  { %484 = vmatmul.mubr.bf16.gmra.mrb[20].mxu0 %v2461_v63 }
  0x4b   :  { %491 = vmatprep.mubr.bf16.mxu0 %v2463_v1  ;;  %2379 = vmatprep.subr.bf16.mxu1 %v2378_v13 }
  0x4c   :  { %1416 = vperm.xlu1 %2416, %v2580_v18   ;;  %2381 = vmatpush3.bf16.msra.mxu1 %v2378_v13  ;;  %v2471_v18 = vld [vmem:[%s3186_s0 + $0x80] ss:$8 sps:$4 sm:$0xff]  }
  0x4d   :  { %1411 = vperm.xlu0 %2415, %v2565_v15   ;;  %v2382_v15 = vpack.c.bf16 %v1167_v29, %v1166_v16 }
  0x4f   :  { %2383 = vmatprep.subr.bf16.mxu1 %v2382_v15 }
  0x50   :  { %1426 = vperm.xlu1 %2416, %v2601_v23   ;;  %2385 = vmatpush3.bf16.msra.mxu1 %v2382_v15  ;;  %v2475_v23 = vld [vmem:[%s3186_s0 + $0xa4] ss:$8 sps:$4 sm:$0xff]  }
  0x51   :  { %1421 = vperm.xlu0 %2415, %v2591_v21   ;;  %v2474_v21 = vld [vmem:[%s3186_s0 + $0x90] ss:$8 sps:$4 sm:$0xff]  }
  0x52   :  { %492 = vmatmul.mubr.bf16.gmra.mrb[24].mxu0 %v2465_v10 }
  0x53   :  { %499 = vmatprep.mubr.bf16.mxu0 %v2466_v14 }
  0x54   :  { %1436 = vperm.xlu1 %2416, %v2619_v27   ;;  %v2478_v27 = vld [vmem:[%s3186_s0 + $0xb4] ss:$8 sps:$4 sm:$0xff]  }
  0x55   :  { %1431 = vperm.xlu0 %2415, %v2609_v25   ;;  %v2477_v25 = vld [vmem:[%s3186_s0 + $0xa0] ss:$8 sps:$4 sm:$0xff]  }
  0x58   :  { %1446 = vperm.xlu1 %2416, %v2640_v32   ;;  %v1169_v32 = vld [vmem:[%s3188_s4 + $0x58] sm:$0xff] }
  0x59   :  { %1441 = vperm.xlu0 %2415, %v2630_v30   ;;  %v1168_v30 = vld [vmem:[%s3188_s4 + $0x50] sm:$0xff] }
  0x5a   :  { %500 = vmatmul.mubr.bf16.gmra.mrb[28].mxu0 %v2468_v26 }
  0x5b   :  { %507 = vmatprep.mubr.bf16.mxu0 %v2469_v28 }
  0x5c   :  { %1456 = vperm.xlu1 %2416, %v2661_v37   ;;  %v2390_v37 = vpack.c.bf16 %v1171_v36, %v1170_v35 }
  0x5d   :  { %1451 = vperm.xlu0 %2415, %v2645_v33   ;;  %v2386_v33 = vpack.c.bf16 %v1169_v32, %v1168_v30 }
  0x5f   :  { %2387 = vmatprep.subr.bf16.mxu1 %v2386_v33 }
  0x60   :  { %1466 = vperm.xlu1 %2416, %v2676_v40   ;;  %2389 = vmatpush3.bf16.msra.mxu1 %v2386_v33 }
  0x61   :  { %1461 = vperm.xlu0 %2415, %v2666_v38   ;;  %2391 = vmatprep.subr.bf16.mxu1 %v2390_v37  ;;  %v1172_v38 = vld [vmem:[%s3188_s4 + $0x70] sm:$0xff] }
  0x62   :  { %508 = vmatmul.mubr.bf16.gmra.mrb[32].mxu0 %v2471_v18  ;;  %v2394_v40 = vpack.c.bf16 %v1173_v39, %v1172_v38 }
  0x63   :  { %515 = vmatprep.mubr.bf16.mxu0 %v2472_v31 }
  0x64   :  { %1476 = vperm.xlu1 %2416, %v2694_v44   ;;  %2393 = vmatpush3.bf16.msra.mxu1 %v2390_v37 }
  0x65   :  { %1471 = vperm.xlu0 %2415, %v2681_v41   ;;  %2395 = vmatprep.subr.bf16.mxu1 %v2394_v40 }
  0x68   :  { %1486 = vperm.xlu1 %2416, %v2712_v48   ;;  %2397 = vmatpush3.bf16.msra.mxu1 %v2394_v40 }
  0x69   :  { %1481 = vperm.xlu0 %2415, %v2702_v46  }
  0x6a   :  { %516 = vmatmul.mubr.bf16.gmra.mrb[36].mxu0 %v2474_v21 }
  0x6b   :  { %523 = vmatprep.mubr.bf16.mxu0 %v2475_v23 }
  0x6c   :  { %1496 = vperm.xlu1 %2416, %v2727_v51  }
  0x6d   :  { %1491 = vperm.xlu0 %2415, %v2717_v49  }
  0x70   :  { %1506 = vperm.xlu1 %2416, %v2745_v55  }
  0x71   :  { %1501 = vperm.xlu0 %2415, %v2738_v54  }
  0x72   :  { %524 = vmatmul.mubr.bf16.gmra.mrb[40].mxu0 %v2477_v25 }
  0x73   :  { %531 = vmatprep.mubr.bf16.mxu0 %v2478_v27 }
  0x74   :  { %1516 = vperm.xlu1 %2416, %v2760_v58  }
  0x75   :  { %1511 = vperm.xlu0 %2415, %v2750_v56  }
  0x78   :  { %1526 = vperm.xlu1 %2416, %v2775_v61  }
  0x79   :  { %1521 = vperm.xlu0 %2415, %v2768_v60  }
  0x7a   :  { %532 = vmatmul.mubr.bf16.gmra.mrb[44].mxu0 %v2480_v34 }
  0x7c   :  { %1536 = vperm.xlu1 %2416, %v2790_v0  }
  0x7d   :  { %1531 = vperm.xlu0 %2415, %v2780_v62  }
  0x80   :  { %1546 = vperm.xlu1 %2416, %v2805_v3  }
  0x81   :  { %1541 = vperm.xlu0 %2415, %v2798_v2  }
  0x84   :  { %1556 = vperm.xlu1 %2416, %v2832_v11  }
  0x85   :  { %1551 = vperm.xlu0 %2415, %v2816_v6   ;;  %v716_v42 = vpop.permute.xlu1 %715 }
  0x88   :  { %v706_v41 = vpop.permute.xlu0 %705 }
  0x89   :  { %v2933_v44 = vpop.permute.xlu1 %720 }
  0x8c   :  { %v711_v43 = vpop.permute.xlu0 %710 }
  0x8d   :  { %v2937_v46 = vpop.permute.xlu1 %730 }
  0x90   :  { %v2935_v45 = vpop.permute.xlu0 %725 }
  0x91   :  { %v2941_v48 = vpop.permute.xlu1 %740 }
  0x94   :  { %v2939_v47 = vpop.permute.xlu0 %735 }
  0x95   :  { %v2945_v50 = vpop.permute.xlu1 %750 }
  0x98   :  { %v2943_v49 = vpop.permute.xlu0 %745 }
  0x99   :  { %v2949_v52 = vpop.permute.xlu1 %760 }
  0x9c   :  { %v2947_v51 = vpop.permute.xlu0 %755 }
  0x9d   :  { %v2953_v54 = vpop.permute.xlu1 %770 }
  0xa0   :  { %v2951_v53 = vpop.permute.xlu0 %765 }
  0xa3   :  { %v2957_v56 = vpop.permute.xlu1 %780 }
  0xa4   :  { %v2955_v55 = vpop.permute.xlu0 %775 }
  0xa7   :  { %v2961_v58 = vpop.permute.xlu1 %790 }
  0xa8   :  { %v2959_v57 = vpop.permute.xlu0 %785 }
  0xab   :  { %v2965_v60 = vpop.permute.xlu1 %800 }
  0xac   :  { %v2963_v59 = vpop.permute.xlu0 %795 }
  0xaf   :  { %v2969_v62 = vpop.permute.xlu1 %810 }
  0xb0   :  { %v2967_v61 = vpop.permute.xlu0 %805 }
  0xb3   :  { %v2973_v0 = vpop.permute.xlu1 %820 }
  0xb4   :  { %v2971_v63 = vpop.permute.xlu0 %815 }
  0xb7   :  { %v831_v26 = vpop.permute.xlu1 %830 }
  0xb8   :  { %v826_v10 = vpop.permute.xlu0 %825 }
  0xbc   :  { %v836_v35 = vpop.permute.xlu0 %835 }
  0xf5   :  { %v2142_v1 = vpop.f32.mrb[0].mxu0  ;;  %v2214_v3 = vpop.f32.mrb[0].mxu1 }
  0xf6   :  { %v2143_v2 = vpop.f32.mrb[1].mxu0  ;;  %v2215_v6 = vpop.f32.mrb[1].mxu1 }
  0xf7   :  { %v2144_v4 = vadd.f32 %v2143_v2, %v2142_v1  ;;  %v2145_v5 = vpop.f32.mrb[2].mxu0  ;;  %v2216_v9 = vadd.f32 %v2215_v6, %v2214_v3  ;;  %v2217_v14 = vpop.f32.mrb[2].mxu1 }
  0xf8   :  { %v2146_v7 = vpop.f32.mrb[3].mxu0  ;;  %v2218_v19 = vpop.f32.mrb[3].mxu1 }
  0xf9   :  { %v863_v11 = vmul.f32 %v2144_v4, %v706_v41  ;;  %v2147_v12 = vadd.f32 %v2146_v7, %v2145_v5  ;;  %v887_v17 = vmul.f32 %v2216_v9, %v826_v10  ;;  %v2219_v24 = vadd.f32 %v2218_v19, %v2217_v14  ;;  %v841_v4 = vpop.permute.xlu1 %840 }
  0xfb   :  { %v864_v20 = vmul.f32 %v2147_v12, %v711_v43  ;;  %v902_v22 = vadd.f32 %v2978_v8, %v863_v11  ;;  %v2982_v13 = vadd.f32 %v2978_v8, %v887_v17  ;;  %v888_v15 = vmul.f32 %v2219_v24, %v831_v26 }
  0xfd   :  { %v903_v28 = vadd.f32 %v2978_v8, %v864_v20  ;;  %v2148_v16 = vpop.f32.mrb[4].mxu0  ;;  %v934_v29 = vmax.f32 %v902_v22, 0.0  ;;  %v2220_v31 = vpop.f32.mrb[4].mxu1  ;;  %v958_v30 = vmax.f32 %v2982_v13, 0.0  ;;  %v2987_v32 = vadd.f32 %v2978_v8, %v888_v15 }
  0xfe   :  { %v2149_v18 = vpop.f32.mrb[5].mxu0  ;;  %v2221_v27 = vpop.f32.mrb[5].mxu1 }
  0xff   :  { %v935_v21 = vmax.f32 %v903_v28, 0.0  ;;  %v2150_v23 = vadd.f32 %v2149_v18, %v2148_v16  ;;  %v2151_v25 = vpop.f32.mrb[6].mxu0  ;;  %2318 = vmatprep.mubr.f32.mxu1 %v934_v29  ;;  %v2222_v34 = vadd.f32 %v2221_v27, %v2220_v31  ;;  %v2223_v39 = vpop.f32.mrb[6].mxu1  ;;  %v959_v40 = vmax.f32 %v2987_v32, 0.0 }
 0x100   :  { %v2152_v33 = vpop.f32.mrb[7].mxu0  ;;  %v2224_v43 = vpop.f32.mrb[7].mxu1 }
 0x101   :  { %v865_v36 = vmul.f32 %v2150_v23, %v716_v42  ;;  %v1939_v37 = vpack.c.bf16 %v935_v21, %v934_v29  ;;  %v2153_v38 = vadd.f32 %v2152_v33, %v2151_v25  ;;  %2319 = vmatmul.mubr.f32.vlgmr.msra.gmra.mrb[16].mxu1 %v935_v21  ;;  %v889_v41 = vmul.f32 %v2222_v34, %v836_v35  ;;  %v846_v16 = vpop.permute.xlu0 %845  ;;  %v851_v27 = vpop.permute.xlu1 %850 }
 0x102   :  { %v2225_v3 = vadd.f32 %v2224_v43, %v2223_v39  ;;  %v1999_v42 = vpack.c.bf16 %v959_v40, %v958_v30 }
 0x103   :  { %1940 = vst [vmem:[%s3190_s5] sm:$0xff] %v1939_v37   ;;  %v866_v1 = vmul.f32 %v2153_v38, %v2933_v44  ;;  %v904_v2 = vadd.f32 %v2978_v8, %v865_v36  ;;  %v3000_v5 = vadd.f32 %v2978_v8, %v889_v41 }
 0x104   :  { %v890_v10 = vmul.f32 %v2225_v3, %v841_v4  ;;  %2107 = vst [vmem:[%s3190_s5 + $0x60] sm:$0xff] %v1999_v42  }
 0x105   :  { %v2154_v6 = vpop.f32.mrb[8].mxu0  ;;  %v936_v7 = vmax.f32 %v904_v2, 0.0  ;;  %v905_v9 = vadd.f32 %v2978_v8, %v866_v1  ;;  %v2226_v11 = vpop.f32.mrb[8].mxu1  ;;  %v960_v20 = vmax.f32 %v3000_v5, 0.0 }
 0x106   :  { %v2155_v44 = vpop.f32.mrb[9].mxu0  ;;  %v2227_v19 = vpop.f32.mrb[9].mxu1  ;;  %v3008_v22 = vadd.f32 %v2978_v8, %v890_v10 }
 0x107   :  { %v2156_v12 = vadd.f32 %v2155_v44, %v2154_v6  ;;  %v2157_v14 = vpop.f32.mrb[10].mxu0  ;;  %2321 = vmatprep.mubr.f32.mxu1 %v936_v7  ;;  %v937_v17 = vmax.f32 %v905_v9, 0.0  ;;  %v2228_v26 = vadd.f32 %v2227_v19, %v2226_v11  ;;  %v2229_v28 = vpop.f32.mrb[10].mxu1 }
 0x108   :  { %v2158_v24 = vpop.f32.mrb[11].mxu0  ;;  %v2230_v31 = vpop.f32.mrb[11].mxu1  ;;  %v961_v21 = vmax.f32 %v3008_v22, 0.0 }
 0x109   :  { %v867_v29 = vmul.f32 %v2156_v12, %v2935_v45  ;;  %v2159_v15 = vadd.f32 %v2158_v24, %v2157_v14  ;;  %v1944_v18 = vpack.c.bf16 %v937_v17, %v936_v7  ;;  %2322 = vmatmul.mubr.f32.gmra.mrb[18].mxu1 %v937_v17  ;;  %v891_v23 = vmul.f32 %v2228_v26, %v846_v16  ;;  %v856_v44 = vpop.permute.xlu0 %855 }
 0x10a   :  { %v2231_v25 = vadd.f32 %v2230_v31, %v2229_v28  ;;  %v2004_v45 = vpack.c.bf16 %v961_v21, %v960_v20  ;;  %v861_v28 = vpop.permute.xlu1 %860 }
 0x10b   :  { %v868_v33 = vmul.f32 %v2159_v15, %v2937_v46  ;;  %2096 = vst [vmem:[%s3190_s5 + $0x8] sm:$0xff] %v1944_v18   ;;  %v906_v34 = vadd.f32 %v2978_v8, %v867_v29  ;;  %v3022_v36 = vadd.f32 %v2978_v8, %v891_v23 }
 0x10c   :  { %v892_v35 = vmul.f32 %v2231_v25, %v851_v27  ;;  %2108 = vst [vmem:[%s3190_s5 + $0x68] sm:$0xff] %v2004_v45  }
 0x10d   :  { %v2160_v37 = vpop.f32.mrb[12].mxu0  ;;  %v938_v38 = vmax.f32 %v906_v34, 0.0  ;;  %v907_v39 = vadd.f32 %v2978_v8, %v868_v33  ;;  %v2232_v41 = vpop.f32.mrb[12].mxu1  ;;  %v962_v43 = vmax.f32 %v3022_v36, 0.0 }
 0x10e   :  { %v2161_v46 = vpop.f32.mrb[13].mxu0  ;;  %v3030_v1 = vadd.f32 %v2978_v8, %v892_v35  ;;  %v2233_v4 = vpop.f32.mrb[13].mxu1 }
 0x10f   :  { %v2162_v2 = vadd.f32 %v2161_v46, %v2160_v37  ;;  %v2163_v3 = vpop.f32.mrb[14].mxu0  ;;  %2324 = vmatprep.mubr.f32.mxu1 %v938_v38  ;;  %v939_v42 = vmax.f32 %v907_v39, 0.0  ;;  %v2234_v7 = vadd.f32 %v2233_v4, %v2232_v41  ;;  %v2235_v9 = vpop.f32.mrb[14].mxu1 }
 0x110   :  { %v2164_v6 = vpop.f32.mrb[15].mxu0  ;;  %v963_v10 = vmax.f32 %v3030_v1, 0.0  ;;  %v2236_v17 = vpop.f32.mrb[15].mxu1 }
 0x111   :  { %v869_v11 = vmul.f32 %v2162_v2, %v2939_v47  ;;  %v2165_v12 = vadd.f32 %v2164_v6, %v2163_v3  ;;  %v1949_v14 = vpack.c.bf16 %v939_v42, %v938_v38  ;;  %2325 = vmatmul.mubr.f32.gmra.mrb[20].mxu1 %v939_v42  ;;  %v893_v19 = vmul.f32 %v2234_v7, %v856_v44 }
 0x112   :  { %v2237_v24 = vadd.f32 %v2236_v17, %v2235_v9  ;;  %v2009_v26 = vpack.c.bf16 %v963_v10, %v962_v43 }
 0x113   :  { %v870_v16 = vmul.f32 %v2165_v12, %v2941_v48  ;;  %2097 = vst [vmem:[%s3190_s5 + $0x10] sm:$0xff] %v1949_v14   ;;  %v908_v47 = vadd.f32 %v2978_v8, %v869_v11  ;;  %v3047_v15 = vadd.f32 %v2978_v8, %v893_v19 }
 0x114   :  { %v894_v29 = vmul.f32 %v2237_v24, %v861_v28  ;;  %2109 = vst [vmem:[%s3190_s5 + $0x70] sm:$0xff] %v2009_v26  }
 0x115   :  { %v2166_v18 = vpop.f32.mrb[16].mxu0  ;;  %v940_v31 = vmax.f32 %v908_v47, 0.0  ;;  %v909_v23 = vadd.f32 %v2978_v8, %v870_v16  ;;  %v964_v48 = vmax.f32 %v3047_v15, 0.0 }
 0x116   :  { %v2167_v25 = vpop.f32.mrb[17].mxu0  ;;  %v3052_v27 = vadd.f32 %v2978_v8, %v894_v29 }
 0x117   :  { %v2168_v33 = vadd.f32 %v2167_v25, %v2166_v18  ;;  %v2169_v34 = vpop.f32.mrb[18].mxu0  ;;  %2327 = vmatprep.mubr.f32.mxu1 %v940_v31  ;;  %v941_v45 = vmax.f32 %v909_v23, 0.0 }
 0x118   :  { %v2170_v35 = vpop.f32.mrb[19].mxu0  ;;  %v965_v37 = vmax.f32 %v3052_v27, 0.0 }
 0x119   :  { %v871_v38 = vmul.f32 %v2168_v33, %v2943_v49  ;;  %v2171_v39 = vadd.f32 %v2170_v35, %v2169_v34  ;;  %v1954_v46 = vpack.c.bf16 %v941_v45, %v940_v31  ;;  %2328 = vmatmul.mubr.f32.gmra.mrb[22].mxu1 %v941_v45 }
 0x11a   :  { %v2014_v41 = vpack.c.bf16 %v965_v37, %v964_v48 }
 0x11b   :  { %v872_v2 = vmul.f32 %v2171_v39, %v2945_v50  ;;  %2098 = vst [vmem:[%s3190_s5 + $0x18] sm:$0xff] %v1954_v46   ;;  %v910_v3 = vadd.f32 %v2978_v8, %v871_v38 }
 0x11c   :  { %2110 = vst [vmem:[%s3190_s5 + $0x78] sm:$0xff] %v2014_v41  }
 0x11d   :  { %v2172_v49 = vpop.f32.mrb[20].mxu0  ;;  %v942_v42 = vmax.f32 %v910_v3, 0.0  ;;  %v911_v4 = vadd.f32 %v2978_v8, %v872_v2 }
 0x11e   :  { %v2173_v6 = vpop.f32.mrb[21].mxu0 }
 0x11f   :  { %v2174_v7 = vadd.f32 %v2173_v6, %v2172_v49  ;;  %v2175_v9 = vpop.f32.mrb[22].mxu0  ;;  %2330 = vmatprep.mubr.f32.mxu1 %v942_v42  ;;  %v943_v44 = vmax.f32 %v911_v4, 0.0 }
 0x120   :  { %v2176_v50 = vpop.f32.mrb[23].mxu0 }
 0x121   :  { %v873_v11 = vmul.f32 %v2174_v7, %v2947_v51  ;;  %v2177_v12 = vadd.f32 %v2176_v50, %v2175_v9  ;;  %v1959_v14 = vpack.c.bf16 %v943_v44, %v942_v42  ;;  %2331 = vmatmul.mubr.f32.gmra.mrb[24].mxu1 %v943_v44 }
 0x123   :  { %v874_v17 = vmul.f32 %v2177_v12, %v2949_v52  ;;  %2099 = vst [vmem:[%s3190_s5 + $0x20] sm:$0xff] %v1959_v14   ;;  %v912_v19 = vadd.f32 %v2978_v8, %v873_v11 }
 0x125   :  { %v2178_v24 = vpop.f32.mrb[24].mxu0  ;;  %v944_v26 = vmax.f32 %v912_v19, 0.0  ;;  %v913_v28 = vadd.f32 %v2978_v8, %v874_v17 }
 0x126   :  { %v2179_v16 = vpop.f32.mrb[25].mxu0 }
 0x127   :  { %v2180_v47 = vadd.f32 %v2179_v16, %v2178_v24  ;;  %v2181_v29 = vpop.f32.mrb[26].mxu0  ;;  %2333 = vmatprep.mubr.f32.mxu1 %v944_v26  ;;  %v945_v51 = vmax.f32 %v913_v28, 0.0 }
 0x128   :  { %v2182_v18 = vpop.f32.mrb[27].mxu0 }
 0x129   :  { %v875_v31 = vmul.f32 %v2180_v47, %v2951_v53  ;;  %v2183_v23 = vadd.f32 %v2182_v18, %v2181_v29  ;;  %v1964_v52 = vpack.c.bf16 %v945_v51, %v944_v26  ;;  %2334 = vmatmul.mubr.f32.gmra.mrb[26].mxu1 %v945_v51 }
 0x12b   :  { %v876_v25 = vmul.f32 %v2183_v23, %v2953_v54  ;;  %2100 = vst [vmem:[%s3190_s5 + $0x28] sm:$0xff] %v1964_v52   ;;  %v914_v33 = vadd.f32 %v2978_v8, %v875_v31 }
 0x12d   :  { %v2184_v34 = vpop.f32.mrb[28].mxu0  ;;  %v946_v45 = vmax.f32 %v914_v33, 0.0  ;;  %v915_v35 = vadd.f32 %v2978_v8, %v876_v25 }
 0x12e   :  { %v2185_v38 = vpop.f32.mrb[29].mxu0 }
 0x12f   :  { %v2186_v39 = vadd.f32 %v2185_v38, %v2184_v34  ;;  %v2187_v46 = vpop.f32.mrb[30].mxu0  ;;  %2336 = vmatprep.mubr.f32.mxu1 %v946_v45  ;;  %v947_v53 = vmax.f32 %v915_v35, 0.0 }
 0x130   :  { %v2188_v41 = vpop.f32.mrb[31].mxu0 }
 0x131   :  { %v877_v2 = vmul.f32 %v2186_v39, %v2955_v55  ;;  %v2189_v3 = vadd.f32 %v2188_v41, %v2187_v46  ;;  %v1969_v54 = vpack.c.bf16 %v947_v53, %v946_v45  ;;  %2337 = vmatmul.mubr.f32.gmra.mrb[28].mxu1 %v947_v53 }
 0x133   :  { %v878_v49 = vmul.f32 %v2189_v3, %v2957_v56  ;;  %2101 = vst [vmem:[%s3190_s5 + $0x30] sm:$0xff] %v1969_v54   ;;  %v916_v42 = vadd.f32 %v2978_v8, %v877_v2 }
 0x135   :  { %v2190_v4 = vpop.f32.mrb[32].mxu0  ;;  %v948_v6 = vmax.f32 %v916_v42, 0.0  ;;  %v917_v7 = vadd.f32 %v2978_v8, %v878_v49 }
 0x136   :  { %v2191_v9 = vpop.f32.mrb[33].mxu0 }
 0x137   :  { %v2192_v44 = vadd.f32 %v2191_v9, %v2190_v4  ;;  %v2193_v50 = vpop.f32.mrb[34].mxu0  ;;  %2339 = vmatprep.mubr.f32.mxu1 %v948_v6  ;;  %v949_v55 = vmax.f32 %v917_v7, 0.0 }
 0x138   :  { %v2194_v11 = vpop.f32.mrb[35].mxu0 }
 0x139   :  { %v879_v12 = vmul.f32 %v2192_v44, %v2959_v57  ;;  %v2195_v14 = vadd.f32 %v2194_v11, %v2193_v50  ;;  %v1974_v56 = vpack.c.bf16 %v949_v55, %v948_v6  ;;  %2340 = vmatmul.mubr.f32.gmra.mrb[30].mxu1 %v949_v55 }
 0x13b   :  { %v880_v17 = vmul.f32 %v2195_v14, %v2961_v58  ;;  %2102 = vst [vmem:[%s3190_s5 + $0x38] sm:$0xff] %v1974_v56   ;;  %v918_v19 = vadd.f32 %v2978_v8, %v879_v12 }
 0x13d   :  { %v2196_v24 = vpop.f32.mrb[36].mxu0  ;;  %v950_v26 = vmax.f32 %v918_v19, 0.0  ;;  %v919_v28 = vadd.f32 %v2978_v8, %v880_v17 }
 0x13e   :  { %v2197_v16 = vpop.f32.mrb[37].mxu0 }
 0x13f   :  { %v2198_v47 = vadd.f32 %v2197_v16, %v2196_v24  ;;  %v2199_v29 = vpop.f32.mrb[38].mxu0  ;;  %2342 = vmatprep.mubr.f32.mxu1 %v950_v26  ;;  %v951_v57 = vmax.f32 %v919_v28, 0.0 }
 0x140   :  { %v2200_v51 = vpop.f32.mrb[39].mxu0 }
 0x141   :  { %v881_v18 = vmul.f32 %v2198_v47, %v2963_v59  ;;  %v2201_v31 = vadd.f32 %v2200_v51, %v2199_v29  ;;  %v1979_v58 = vpack.c.bf16 %v951_v57, %v950_v26  ;;  %2343 = vmatmul.mubr.f32.gmra.mrb[32].mxu1 %v951_v57 }
 0x143   :  { %v882_v23 = vmul.f32 %v2201_v31, %v2965_v60  ;;  %2103 = vst [vmem:[%s3190_s5 + $0x40] sm:$0xff] %v1979_v58   ;;  %v920_v52 = vadd.f32 %v2978_v8, %v881_v18 }
 0x145   :  { %v2202_v25 = vpop.f32.mrb[40].mxu0  ;;  %v952_v33 = vmax.f32 %v920_v52, 0.0  ;;  %v921_v34 = vadd.f32 %v2978_v8, %v882_v23 }
 0x146   :  { %v2203_v45 = vpop.f32.mrb[41].mxu0 }
 0x147   :  { %v2204_v35 = vadd.f32 %v2203_v45, %v2202_v25  ;;  %v2205_v38 = vpop.f32.mrb[42].mxu0  ;;  %2345 = vmatprep.mubr.f32.mxu1 %v952_v33  ;;  %v953_v59 = vmax.f32 %v921_v34, 0.0 }
 0x148   :  { %v2206_v39 = vpop.f32.mrb[43].mxu0 }
 0x149   :  { %v883_v46 = vmul.f32 %v2204_v35, %v2967_v61  ;;  %v2207_v53 = vadd.f32 %v2206_v39, %v2205_v38  ;;  %v1984_v60 = vpack.c.bf16 %v953_v59, %v952_v33  ;;  %2346 = vmatmul.mubr.f32.gmra.mrb[34].mxu1 %v953_v59 }
 0x14b   :  { %v884_v41 = vmul.f32 %v2207_v53, %v2969_v62  ;;  %2104 = vst [vmem:[%s3190_s5 + $0x48] sm:$0xff] %v1984_v60   ;;  %v922_v2 = vadd.f32 %v2978_v8, %v883_v46 }
 0x14d   :  { %v2208_v3 = vpop.f32.mrb[44].mxu0  ;;  %v954_v54 = vmax.f32 %v922_v2, 0.0  ;;  %v923_v49 = vadd.f32 %v2978_v8, %v884_v41 }
 0x14e   :  { %v2209_v42 = vpop.f32.mrb[45].mxu0 }
 0x14f   :  { %v2210_v4 = vadd.f32 %v2209_v42, %v2208_v3  ;;  %v2211_v6 = vpop.f32.mrb[46].mxu0  ;;  %2348 = vmatprep.mubr.f32.mxu1 %v954_v54  ;;  %v955_v61 = vmax.f32 %v923_v49, 0.0 }
 0x150   :  { %v2212_v7 = vpop.f32.mrb[47].mxu0 }
 0x151   :  { %v885_v9 = vmul.f32 %v2210_v4, %v2971_v63  ;;  %v2213_v44 = vadd.f32 %v2212_v7, %v2211_v6  ;;  %v1989_v62 = vpack.c.bf16 %v955_v61, %v954_v54  ;;  %2349 = vmatmul.mubr.f32.gmra.mrb[36].mxu1 %v955_v61  ;;  %v1407_v63 = vpop.permute.xlu1 %1406 }
 0x153   :  { %v886_v50 = vmul.f32 %v2213_v44, %v2973_v0  ;;  %2105 = vst [vmem:[%s3190_s5 + $0x50] sm:$0xff] %v1989_v62   ;;  %v924_v55 = vadd.f32 %v2978_v8, %v885_v9 }
 0x155   :  { %v956_v11 = vmax.f32 %v924_v55, 0.0  ;;  %v925_v12 = vadd.f32 %v2978_v8, %v886_v50  ;;  %v1402_v8 = vpop.permute.xlu0 %1401  ;;  %v1417_v5 = vpop.permute.xlu1 %1416 }
 0x157   :  { %2351 = vmatprep.mubr.f32.mxu1 %v956_v11  ;;  %v957_v14 = vmax.f32 %v925_v12, 0.0 }
 0x159   :  { %v1994_v56 = vpack.c.bf16 %v957_v14, %v956_v11  ;;  %2352 = vmatmul.mubr.f32.gmra.mrb[38].mxu1 %v957_v14  ;;  %v1412_v22 = vpop.permute.xlu0 %1411 }
 0x15a   :  { %2354 = vmatprep.mubr.f32.mxu1 %v958_v30 }
 0x15b   :  { %2106 = vst [vmem:[%s3190_s5 + $0x58] sm:$0xff] %v1994_v56  }
 0x15d   :  { %2355 = vmatmul.mubr.f32.gmra.mrb[40].mxu1 %v959_v40 }
 0x15e   :  { %2357 = vmatprep.mubr.f32.mxu1 %v960_v20 }
 0x161   :  { %2358 = vmatmul.mubr.f32.gmra.mrb[42].mxu1 %v961_v21 }
 0x162   :  { %2360 = vmatprep.mubr.f32.mxu1 %v962_v43 }
 0x165   :  { %2361 = vmatmul.mubr.f32.gmra.mrb[44].mxu1 %v963_v10  ;;  %v1427_v10 = vpop.permute.xlu1 %1426 }
 0x166   :  { %2363 = vmatprep.mubr.f32.mxu1 %v964_v48  ;;  %v1422_v48 = vpop.permute.xlu0 %1421 }
 0x169   :  { %2364 = vmatmul.mubr.f32.gmra.mrb[46].mxu1 %v965_v37  ;;  %v1437_v24 = vpop.permute.xlu1 %1436 }
 0x16a   :  { %v1432_v28 = vpop.permute.xlu0 %1431 }
 0x16d   :  { %v1447_v51 = vpop.permute.xlu1 %1446 }
 0x16e   :  { %v1442_v31 = vpop.permute.xlu0 %1441 }
 0x171   :  { %v1457_v33 = vpop.permute.xlu1 %1456 }
 0x172   :  { %v1452_v45 = vpop.permute.xlu0 %1451 }
 0x175   :  { %v1467_v46 = vpop.permute.xlu1 %1466 }
 0x176   :  { %v1462_v60 = vpop.permute.xlu0 %1461 }
 0x179   :  { %v1477_v49 = vpop.permute.xlu1 %1476 }
 0x17a   :  { %v1472_v4 = vpop.permute.xlu0 %1471 }
 0x17d   :  { %v1487_v44 = vpop.permute.xlu1 %1486 }
 0x17e   :  { %v1482_v62 = vpop.permute.xlu0 %1481 }
 0x181   :  { %v1497_v14 = vpop.permute.xlu1 %1496 }
 0x1d4   :  { %v2320_v0 = vpop.f32.mrb[16].mxu1 }
 0x1d5   :  { %v1560_v13 = vmul.f32 %v2320_v0, %v1407_v63  ;;  %v1240_v30 = vpop.f32.mrb[17].mxu1  ;;  %v1492_v63 = vpop.permute.xlu0 %1491 }
 0x1d6   :  { %v1559_v32 = vmul.f32 %v1402_v8, %v1240_v30  ;;  %v1507_v30 = vpop.permute.xlu1 %1506 }
 0x1d8   :  { %v2019_v40 = vpack.c.bf16 %v1560_v13, %v1559_v32 }
 0x1da   :  { %2020 = vst [vmem:[%s3191_s6] sm:$0xff] %v2019_v40   ;;  %v1502_v40 = vpop.permute.xlu0 %1501 }
 0x1dc   :  { %v2323_v20 = vpop.f32.mrb[18].mxu1 }
 0x1dd   :  { %v1562_v21 = vmul.f32 %v2323_v20, %v1417_v5  ;;  %v1250_v36 = vpop.f32.mrb[19].mxu1  ;;  %v1517_v20 = vpop.permute.xlu1 %1516 }
 0x1de   :  { %v1561_v43 = vmul.f32 %v1412_v22, %v1250_v36 }
 0x1e0   :  { %v2024_v1 = vpack.c.bf16 %v1562_v21, %v1561_v43  ;;  %v1512_v21 = vpop.permute.xlu0 %1511 }
 0x1e2   :  { %2111 = vst [vmem:[%s3191_s6 + $0x8] sm:$0xff] %v2024_v1  }
 0x1e4   :  { %v2326_v15 = vpop.f32.mrb[20].mxu1 }
 0x1e5   :  { %v1564_v27 = vmul.f32 %v2326_v15, %v1427_v10  ;;  %v1260_v37 = vpop.f32.mrb[21].mxu1  ;;  %v1527_v15 = vpop.permute.xlu1 %1526 }
 0x1e6   :  { %v1563_v17 = vmul.f32 %v1422_v48, %v1260_v37  ;;  %v1522_v48 = vpop.permute.xlu0 %1521 }
 0x1e8   :  { %v2029_v19 = vpack.c.bf16 %v1564_v27, %v1563_v17 }
 0x1ea   :  { %2112 = vst [vmem:[%s3191_s6 + $0x10] sm:$0xff] %v2029_v19  }
 0x1ec   :  { %v2329_v26 = vpop.f32.mrb[22].mxu1 }
 0x1ed   :  { %v1566_v16 = vmul.f32 %v2329_v26, %v1437_v24  ;;  %v1270_v47 = vpop.f32.mrb[23].mxu1  ;;  %v1537_v24 = vpop.permute.xlu1 %1536 }
 0x1ee   :  { %v1565_v29 = vmul.f32 %v1432_v28, %v1270_v47 }
 0x1f0   :  { %v2034_v57 = vpack.c.bf16 %v1566_v16, %v1565_v29  ;;  %v1532_v16 = vpop.permute.xlu0 %1531 }
 0x1f2   :  { %2113 = vst [vmem:[%s3191_s6 + $0x18] sm:$0xff] %v2034_v57  }
 0x1f4   :  { %v2332_v18 = vpop.f32.mrb[24].mxu1 }
 0x1f5   :  { %v1568_v58 = vmul.f32 %v2332_v18, %v1447_v51  ;;  %v1280_v23 = vpop.f32.mrb[25].mxu1 }
 0x1f6   :  { %v1567_v52 = vmul.f32 %v1442_v31, %v1280_v23  ;;  %v1547_v23 = vpop.permute.xlu1 %1546 }
 0x1f8   :  { %v2039_v25 = vpack.c.bf16 %v1568_v58, %v1567_v52 }
 0x1fa   :  { %2114 = vst [vmem:[%s3191_s6 + $0x20] sm:$0xff] %v2039_v25   ;;  %v1542_v25 = vpop.permute.xlu0 %1541 }
 0x1fc   :  { %v2335_v34 = vpop.f32.mrb[26].mxu1 }
 0x1fd   :  { %v1570_v35 = vmul.f32 %v2335_v34, %v1457_v33  ;;  %v1290_v38 = vpop.f32.mrb[27].mxu1 }
 0x1fe   :  { %v1569_v59 = vmul.f32 %v1452_v45, %v1290_v38 }
 0x200   :  { %v2044_v39 = vpack.c.bf16 %v1570_v35, %v1569_v59  ;;  %v1557_v59 = vpop.permute.xlu1 %1556 }
 0x202   :  { %2115 = vst [vmem:[%s3191_s6 + $0x28] sm:$0xff] %v2044_v39  }
 0x204   :  { %v2338_v53 = vpop.f32.mrb[28].mxu1 }
 0x205   :  { %v1572_v41 = vmul.f32 %v2338_v53, %v1467_v46  ;;  %v1300_v2 = vpop.f32.mrb[29].mxu1  ;;  %v1552_v53 = vpop.permute.xlu0 %1551 }
 0x206   :  { %v1571_v3 = vmul.f32 %v1462_v60, %v1300_v2 }
 0x208   :  { %v2049_v54 = vpack.c.bf16 %v1572_v41, %v1571_v3 }
 0x20a   :  { %2116 = vst [vmem:[%s3191_s6 + $0x30] sm:$0xff] %v2049_v54  }
 0x20c   :  { %v2341_v42 = vpop.f32.mrb[30].mxu1 }
 0x20d   :  { %v1574_v6 = vmul.f32 %v2341_v42, %v1477_v49  ;;  %v1310_v61 = vpop.f32.mrb[31].mxu1 }
 0x20e   :  { %v1573_v7 = vmul.f32 %v1472_v4, %v1310_v61 }
 0x210   :  { %v2054_v9 = vpack.c.bf16 %v1574_v6, %v1573_v7 }
 0x212   :  { %2117 = vst [vmem:[%s3191_s6 + $0x38] sm:$0xff] %v2054_v9  }
 0x214   :  { %v2344_v50 = vpop.f32.mrb[32].mxu1 }
 0x215   :  { %v1576_v55 = vmul.f32 %v2344_v50, %v1487_v44  ;;  %v1320_v11 = vpop.f32.mrb[33].mxu1 }
 0x216   :  { %v1575_v12 = vmul.f32 %v1482_v62, %v1320_v11 }
 0x218   :  { %v2059_v56 = vpack.c.bf16 %v1576_v55, %v1575_v12 }
 0x21a   :  { %2118 = vst [vmem:[%s3191_s6 + $0x40] sm:$0xff] %v2059_v56  }
 0x21c   :  { %v2347_v0 = vpop.f32.mrb[34].mxu1 }
 0x21d   :  { %v1578_v8 = vmul.f32 %v2347_v0, %v1497_v14  ;;  %v1330_v13 = vpop.f32.mrb[35].mxu1 }
 0x21e   :  { %v1577_v32 = vmul.f32 %v1492_v63, %v1330_v13 }
 0x220   :  { %v2064_v5 = vpack.c.bf16 %v1578_v8, %v1577_v32 }
 0x222   :  { %2119 = vst [vmem:[%s3191_s6 + $0x48] sm:$0xff] %v2064_v5  }
 0x224   :  { %v2350_v22 = vpop.f32.mrb[36].mxu1 }
 0x225   :  { %v1580_v36 = vmul.f32 %v2350_v22, %v1507_v30  ;;  %v1340_v43 = vpop.f32.mrb[37].mxu1 }
 0x226   :  { %v1579_v1 = vmul.f32 %v1502_v40, %v1340_v43 }
 0x228   :  { %v2069_v10 = vpack.c.bf16 %v1580_v36, %v1579_v1 }
 0x22a   :  { %2120 = vst [vmem:[%s3191_s6 + $0x50] sm:$0xff] %v2069_v10  }
 0x22c   :  { %v2353_v27 = vpop.f32.mrb[38].mxu1 }
 0x22d   :  { %v1582_v37 = vmul.f32 %v2353_v27, %v1517_v20  ;;  %v1350_v17 = vpop.f32.mrb[39].mxu1 }
 0x22e   :  { %v1581_v19 = vmul.f32 %v1512_v21, %v1350_v17 }
 0x230   :  { %v2074_v26 = vpack.c.bf16 %v1582_v37, %v1581_v19  ;;  %v2356_v28 = vpop.f32.mrb[40].mxu1 }
 0x231   :  { %v1584_v47 = vmul.f32 %v2356_v28, %v1527_v15  ;;  %v1360_v29 = vpop.f32.mrb[41].mxu1 }
 0x232   :  { %2121 = vst [vmem:[%s3191_s6 + $0x58] sm:$0xff] %v2074_v26   ;;  %v1583_v57 = vmul.f32 %v1522_v48, %v1360_v29 }
 0x234   :  { %v2079_v51 = vpack.c.bf16 %v1584_v47, %v1583_v57  ;;  %v2359_v18 = vpop.f32.mrb[42].mxu1 }
 0x235   :  { %v1586_v31 = vmul.f32 %v2359_v18, %v1537_v24  ;;  %v1370_v58 = vpop.f32.mrb[43].mxu1 }
 0x236   :  { %2122 = vst [vmem:[%s3191_s6 + $0x60] sm:$0xff] %v2079_v51   ;;  %v1585_v52 = vmul.f32 %v1532_v16, %v1370_v58 }
 0x238   :  { %v2084_v33 = vpack.c.bf16 %v1586_v31, %v1585_v52  ;;  %v2362_v34 = vpop.f32.mrb[44].mxu1 }
 0x239   :  { %v1588_v45 = vmul.f32 %v2362_v34, %v1547_v23  ;;  %v1380_v35 = vpop.f32.mrb[45].mxu1 }
 0x23a   :  { %2123 = vst [vmem:[%s3191_s6 + $0x68] sm:$0xff] %v2084_v33   ;;  %v1587_v38 = vmul.f32 %v1542_v25, %v1380_v35 }
 0x23c   :  { %v2089_v39 = vpack.c.bf16 %v1588_v45, %v1587_v38  ;;  %v2365_v46 = vpop.f32.mrb[46].mxu1 }
 0x23d   :  { %v1590_v60 = vmul.f32 %v2365_v46, %v1557_v59  ;;  %v1390_v41 = vpop.f32.mrb[47].mxu1 }
 0x23e   :  { %2124 = vst [vmem:[%s3191_s6 + $0x70] sm:$0xff] %v2089_v39   ;;  %v1589_v2 = vmul.f32 %v1552_v53, %v1390_v41 }
 0x240   :  { %v2094_v3 = vpack.c.bf16 %v1590_v60, %v1589_v2 }
 0x242   :  { %2125 = vst [vmem:[%s3191_s6 + $0x78] sm:$0xff] %v2094_v3  }

</bundles_post_ra>
